<compile_context>
chip_gen: v7x
topology: tpu7x:2x2x1
jax: 0.10.0
libtpu: 0.0.40
codegen_flags: <defaults>
</compile_context>

<pallas_src>
import functools

import jax
import jax.numpy as jnp
from jax import lax
from jax.experimental import pallas as pl
from jax.experimental.pallas import tpu as pltpu


def _round_up(x, m):
    return (x + m - 1) // m * m


# ------------------------------ Pallas kernel -------------------------------


def _fused_resblock_kernel(x_ref, w1_ref, b1_ref, w2_ref, b2_ref, g_ref, be_ref,
                           mask_ref, out_ref, cols_ref, h1pad_ref, *,
                           H, W, Wp, C, K, P, eps):
    """One batch element of: conv1 -> ReLU -> conv2 -> InstanceNorm(affine)
    -> +x -> ReLU, fully fused in VMEM.

    Layout (channels on sublanes, flattened spatial on lanes):
      x_ref      (C, L)      f32   zero-padded input canvas, row-major (Hp, Wp)
                                   flattened + zero tail.
      w*_ref     (C, K*K*C)  bf16  weights, [cout, (kh*K+kw)*C + cin].
      b*/g/be    (C, 1)      f32   bias / InstanceNorm affine params.
      mask_ref   (1, M)      f32   1.0 at the W valid columns of each Wp-wide row.
      out_ref    (C, M)      f32   flattened (H, Wp) output (masked cols = junk).
      cols_ref   (K*K*C, M)  bf16  scratch: stacked tap columns (in-VMEM im2col).
      h1pad_ref  (C, L)      bf16  scratch: zero-padded canvas holding ReLU(conv1).
    """
    taps = K * K
    M = H * Wp                      # flattened output length per channel
    D = P * Wp + P                  # canvas offset of logical spatial (0, 0)
    mask = mask_ref[...]            # (1, M) -- hoisted, used three times below
    inv_count = 1.0 / (H * W)

    # ---- conv1: gather the K*K shifted views (static lane slices of the
    # resident canvas) into one (K*K*C, M) tap matrix, then a single MXU matmul.
    for t in range(taps):           # static unroll, 9 cheap shifted copies
        kh, kw = divmod(t, K)
        off = kh * Wp + kw
        cols_ref[t * C:(t + 1) * C, :] = x_ref[:, off:off + M].astype(cols_ref.dtype)
    acc1 = jnp.dot(w1_ref[...], cols_ref[...], preferred_element_type=jnp.float32)
    # Bias + ReLU in f32.  Zero the Wp-W junk columns so they become conv2's
    # horizontal zero padding once laid back onto the canvas below.
    h1 = jnp.maximum(acc1 + b1_ref[...], 0.0) * mask

    # ---- stage ReLU(conv1) on a zeroed VMEM canvas (h1 never touches HBM)
    h1pad_ref[...] = jnp.zeros(h1pad_ref.shape, h1pad_ref.dtype)
    h1pad_ref[:, D:D + M] = h1.astype(h1pad_ref.dtype)

    # ---- conv2: same single fused matmul, taps sliced from the staged canvas
    for t in range(taps):
        kh, kw = divmod(t, K)
        off = kh * Wp + kw
        cols_ref[t * C:(t + 1) * C, :] = h1pad_ref[:, off:off + M]
    acc2 = jnp.dot(w2_ref[...], cols_ref[...], preferred_element_type=jnp.float32)
    h2 = acc2 + b2_ref[...]

    # ---- InstanceNorm2d: biased variance over the H*W valid positions, f32
    h2m = h2 * mask
    mean = jnp.sum(h2m, axis=1, keepdims=True) * inv_count            # (C, 1)
    cent = (h2 - mean) * mask
    var = jnp.sum(cent * cent, axis=1, keepdims=True) * inv_count     # (C, 1)
    hn = (h2 - mean) * lax.rsqrt(var + eps) * g_ref[...] + be_ref[...]

    # ---- residual (re-read from the interior of the resident f32 canvas) + ReLU
    out_ref[...] = jnp.maximum(hn + x_ref[:, D:D + M], 0.0)


# ------------------------------- JAX wrapper ---------------------------------


def residual_block(x_nchw, params, *, kernel_size=3, stride=1, padding=None,
                   eps=1e-5, matmul_dtype=jnp.bfloat16,
                   vmem_limit_bytes=48 * 1024 * 1024):
    """Fused Pallas TPU implementation of ResidualBlock.forward.

    Supports the configuration the Decoder uses: stride=1, 'same' convolution
    (2*padding == kernel_size - 1).  Conv weights are expected in HWIO layout
    (K, K, Cin, Cout).
    """
    if padding is None:
        padding = 1
    w1, b1, w2, b2, gamma, beta = params
    N, C, H, W = x_nchw.shape
    K, P = kernel_size, padding
    assert stride == 1 and 2 * P == K - 1, "supports stride=1 'same' convs only"
    taps = K * K
    Cp = _round_up(C, 8)                      # sublane-align the tiny channel dim
    Hp, Wp = H + 2 * P, W + 2 * P
    M = H * Wp                                # flattened spatial (lane dim)
    L = _round_up(Hp * Wp + (K - 1), 128)     # canvas length (+ tap overrun), lane aligned

    # ---- glue: cheap layout-only work (pad + flatten).  No im2col, no 9x blowup.
    x = x_nchw.astype(jnp.float32)
    canvas = jnp.pad(x, ((0, 0), (0, Cp - C), (P, P), (P, P))).reshape(N, Cp, Hp * Wp)
    canvas = jnp.pad(canvas, ((0, 0), (0, 0), (0, L - Hp * Wp)))

    def prep_w(w):   # (K, K, Cin, Cout) -> (Cout_p, K*K*Cin_p), bf16 for the MXU
        w = jnp.pad(w.astype(jnp.float32), ((0, 0), (0, 0), (0, Cp - C), (0, Cp - C)))
        return jnp.transpose(w, (3, 0, 1, 2)).reshape(Cp, taps * Cp).astype(matmul_dtype)

    def prep_c(v, pad_value=0.0):   # per-channel vector -> (Cp, 1) f32 column
        return jnp.pad(v.astype(jnp.float32), (0, Cp - C),
                       constant_values=pad_value).reshape(Cp, 1)

    w1m, w2m = prep_w(w1), prep_w(w2)
    b1c, b2c = prep_c(b1), prep_c(b2)
    gc, bec = prep_c(gamma, 1.0), prep_c(beta)
    mask = ((jnp.arange(M, dtype=jnp.int32) % Wp) < W).astype(jnp.float32).reshape(1, M)

    kernel = functools.partial(_fused_resblock_kernel, H=H, W=W, Wp=Wp, C=Cp,
                               K=K, P=P, eps=eps)
    const = lambda n: (0, 0)   # params stay VMEM-resident across the batch grid

    out_flat = pl.pallas_call(
        kernel,
        out_shape=jax.ShapeDtypeStruct((N, Cp, M), jnp.float32),
        grid_spec=pltpu.PrefetchScalarGridSpec(
            num_scalar_prefetch=0,
            grid=(N,),
            in_specs=[
                pl.BlockSpec((None, Cp, L), lambda n: (n, 0, 0)),   # input canvas
                pl.BlockSpec((Cp, taps * Cp), const),               # w1
                pl.BlockSpec((Cp, 1), const),                       # b1
                pl.BlockSpec((Cp, taps * Cp), const),               # w2
                pl.BlockSpec((Cp, 1), const),                       # b2
                pl.BlockSpec((Cp, 1), const),                       # gamma
                pl.BlockSpec((Cp, 1), const),                       # beta
                pl.BlockSpec((1, M), const),                        # valid-column mask
            ],
            out_specs=pl.BlockSpec((None, Cp, M), lambda n: (n, 0, 0)),
            scratch_shapes=[
                pltpu.VMEM((taps * Cp, M), matmul_dtype),   # stacked tap columns
                pltpu.VMEM((Cp, L), matmul_dtype),          # padded ReLU(conv1) canvas
            ]),
        compiler_params=pltpu.CompilerParams(
            dimension_semantics=("parallel",),
            vmem_limit_bytes=vmem_limit_bytes),
    )(canvas, w1m, b1c, w2m, b2c, gc, bec, mask)

    # drop channel / column padding: (N, Cp, H*Wp) -> (N, C, H, W), already NCHW
    return out_flat.reshape(N, Cp, H, Wp)[:, :C, :, :W]


# ---------------------------- pure-JAX reference -----------------------------


def residual_block_ref(x_nchw, params, *, padding=1, eps=1e-5, cast_dtype=None):
    """Reference.  cast_dtype=bfloat16 mimics the kernel's matmul-input casts."""
    w1, b1, w2, b2, gamma, beta = params

    def cast(a):
        return a if cast_dtype is None else a.astype(cast_dtype).astype(jnp.float32)

    def conv(x, w, b):
        w_oihw = jnp.transpose(w, (3, 2, 0, 1))
        y = lax.conv_general_dilated(
            cast(x), cast(w_oihw), window_strides=(1, 1),
            padding=[(padding, padding), (padding, padding)],
            dimension_numbers=("NCHW", "OIHW", "NCHW"))
        return y + b[None, :, None, None]

    h = jnp.maximum(conv(x_nchw, w1, b1), 0.0)
    h = conv(h, w2, b2)
    mean = h.mean(axis=(2, 3), keepdims=True)
    var = ((h - mean) ** 2).mean(axis=(2, 3), keepdims=True)
    h = (h - mean) / jnp.sqrt(var + eps)
    h = h * gamma[None, :, None, None] + beta[None, :, None, None]
    return jnp.maximum(h + x_nchw, 0.0)


# ----------------------------------- main ------------------------------------


if __name__ == "__main__":
    # Small shapes consistent with the Decoder: its 10 ResidualBlocks run with
    # channel = latent_channels = 10, kernel 3, stride 1, padding 1.  W is
    # chosen so the padded row width (W + 2) makes the flattened spatial lane
    # dim H*(W+2) a multiple of 128 (lane-dense stores); any H/W works.
    N, C, H, W = 2, 10, 16, 30
    K, P = 3, 1

    key = jax.random.PRNGKey(0)
    ks = jax.random.split(key, 7)
    x = jax.random.normal(ks[0], (N, C, H, W), jnp.float32)
    # Shapes match nn.Conv2d(C, C, 3, padding=1) / nn.InstanceNorm2d(C, affine=True);
    # conv weights stored as HWIO.
    w1 = 0.1 * jax.random.normal(ks[1], (K, K, C, C), jnp.float32)
    b1 = 0.1 * jax.random.normal(ks[2], (C,), jnp.float32)
    w2 = 0.1 * jax.random.normal(ks[3], (K, K, C, C), jnp.float32)
    b2 = 0.1 * jax.random.normal(ks[4], (C,), jnp.float32)
    gamma = 1.0 + 0.1 * jax.random.normal(ks[5], (C,), jnp.float32)
    beta = 0.1 * jax.random.normal(ks[6], (C,), jnp.float32)
    params = (w1, b1, w2, b2, gamma, beta)

    out = jax.block_until_ready(residual_block(x, params, kernel_size=K, padding=P))
    assert out.shape == (N, C, H, W)

    # Tight check: reference with the same bf16 cast points as the kernel
    # (validates conv indexing, fusion, InstanceNorm, residual).
    ref_bf16 = residual_block_ref(x, params, padding=P, cast_dtype=jnp.bfloat16)
    err_tight = float(jnp.max(jnp.abs(out - ref_bf16)))
    assert err_tight < 1e-2, f"tight (bf16-matched) check failed: {err_tight}"

    # Loose check: pure-f32 reference; the gap is bounded by the intentional
    # bf16 rounding of the matmul operands.
    ref_f32 = residual_block_ref(x, params, padding=P, cast_dtype=None)
    err_f32 = float(jnp.max(jnp.abs(out - ref_f32)))
    assert err_f32 < 1e-1, f"f32 check failed: {err_f32}"

    print("KERNEL_OK")
</pallas_src>

<mosaic_0001>
module attributes {stable_mosaic.version = 11 : i64} {
  func.func @_fused_resblock_kernel(%arg0: i32, %arg1: memref<1x16x640xf32, #tpu.memory_space<vmem>>, %arg2: memref<16x144xbf16, #tpu.memory_space<vmem>>, %arg3: memref<16x1xf32, #tpu.memory_space<vmem>>, %arg4: memref<16x144xbf16, #tpu.memory_space<vmem>>, %arg5: memref<16x1xf32, #tpu.memory_space<vmem>>, %arg6: memref<16x1xf32, #tpu.memory_space<vmem>>, %arg7: memref<16x1xf32, #tpu.memory_space<vmem>>, %arg8: memref<1x512xf32, #tpu.memory_space<vmem>>, %arg9: memref<1x16x512xf32, #tpu.memory_space<vmem>>, %arg10: memref<144x512xbf16, #tpu.memory_space<vmem>>, %arg11: memref<16x640xbf16, #tpu.memory_space<vmem>>) attributes {dimension_semantics = [#tpu.dimension_semantics<parallel>], iteration_bounds = array<i64: 2>, scalar_prefetch = 0 : i64, scratch_operands = 2 : i64, tpu.core_type = #tpu.core_type<tc>, window_params = [{transform_indices = @transform_0, window_bounds = array<i64: 1, 16, 640>}, {pipeline_mode = #tpu.pipeline_mode<synchronous>, transform_indices = @transform_1, window_bounds = array<i64: 16, 144>}, {pipeline_mode = #tpu.pipeline_mode<synchronous>, transform_indices = @transform_2, window_bounds = array<i64: 16, 1>}, {pipeline_mode = #tpu.pipeline_mode<synchronous>, transform_indices = @transform_3, window_bounds = array<i64: 16, 144>}, {pipeline_mode = #tpu.pipeline_mode<synchronous>, transform_indices = @transform_4, window_bounds = array<i64: 16, 1>}, {pipeline_mode = #tpu.pipeline_mode<synchronous>, transform_indices = @transform_5, window_bounds = array<i64: 16, 1>}, {pipeline_mode = #tpu.pipeline_mode<synchronous>, transform_indices = @transform_6, window_bounds = array<i64: 16, 1>}, {pipeline_mode = #tpu.pipeline_mode<synchronous>, transform_indices = @transform_7, window_bounds = array<i64: 1, 512>}, {transform_indices = @transform_8, window_bounds = array<i64: 1, 16, 512>}]} {
    %c0 = arith.constant 0 : index
    %c0_0 = arith.constant 0 : index
    %0 = vector.load %arg8[%c0, %c0_0] : memref<1x512xf32, #tpu.memory_space<vmem>>, vector<1x512xf32>
    %c0_1 = arith.constant 0 : index
    %c0_2 = arith.constant 0 : index
    %c0_3 = arith.constant 0 : index
    %1 = vector.load %arg1[%c0_1, %c0_2, %c0_3] : memref<1x16x640xf32, #tpu.memory_space<vmem>>, vector<1x16x512xf32>
    %2 = vector.shape_cast %1 : vector<1x16x512xf32> to vector<16x512xf32>
    %3 = arith.truncf %2 : vector<16x512xf32> to vector<16x512xbf16>
    %c0_4 = arith.constant 0 : index
    %c0_5 = arith.constant 0 : index
    %4 = vector.load %arg10[%c0_4, %c0_5] : memref<144x512xbf16, #tpu.memory_space<vmem>>, vector<16x512xbf16>
    tpu.vector_store %arg10[%c0_4, %c0_5], %3 {strides = array<i32>} : memref<144x512xbf16, #tpu.memory_space<vmem>>, vector<16x512xbf16>,
    %c0_6 = arith.constant 0 : index
    %c0_7 = arith.constant 0 : index
    %c1 = arith.constant 1 : index
    %5 = vector.load %arg1[%c0_6, %c0_7, %c1] : memref<1x16x640xf32, #tpu.memory_space<vmem>>, vector<1x16x512xf32>
    %6 = vector.shape_cast %5 : vector<1x16x512xf32> to vector<16x512xf32>
    %7 = arith.truncf %6 : vector<16x512xf32> to vector<16x512xbf16>
    %c16 = arith.constant 16 : index
    %c0_8 = arith.constant 0 : index
    %8 = vector.load %arg10[%c16, %c0_8] : memref<144x512xbf16, #tpu.memory_space<vmem>>, vector<16x512xbf16>
    tpu.vector_store %arg10[%c16, %c0_8], %7 {strides = array<i32>} : memref<144x512xbf16, #tpu.memory_space<vmem>>, vector<16x512xbf16>,
    %c0_9 = arith.constant 0 : index
    %c0_10 = arith.constant 0 : index
    %c2 = arith.constant 2 : index
    %9 = vector.load %arg1[%c0_9, %c0_10, %c2] : memref<1x16x640xf32, #tpu.memory_space<vmem>>, vector<1x16x512xf32>
    %10 = vector.shape_cast %9 : vector<1x16x512xf32> to vector<16x512xf32>
    %11 = arith.truncf %10 : vector<16x512xf32> to vector<16x512xbf16>
    %c32 = arith.constant 32 : index
    %c0_11 = arith.constant 0 : index
    %12 = vector.load %arg10[%c32, %c0_11] : memref<144x512xbf16, #tpu.memory_space<vmem>>, vector<16x512xbf16>
    tpu.vector_store %arg10[%c32, %c0_11], %11 {strides = array<i32>} : memref<144x512xbf16, #tpu.memory_space<vmem>>, vector<16x512xbf16>,
    %c0_12 = arith.constant 0 : index
    %c0_13 = arith.constant 0 : index
    %c32_14 = arith.constant 32 : index
    %13 = vector.load %arg1[%c0_12, %c0_13, %c32_14] : memref<1x16x640xf32, #tpu.memory_space<vmem>>, vector<1x16x512xf32>
    %14 = vector.shape_cast %13 : vector<1x16x512xf32> to vector<16x512xf32>
    %15 = arith.truncf %14 : vector<16x512xf32> to vector<16x512xbf16>
    %c48 = arith.constant 48 : index
    %c0_15 = arith.constant 0 : index
    %16 = vector.load %arg10[%c48, %c0_15] : memref<144x512xbf16, #tpu.memory_space<vmem>>, vector<16x512xbf16>
    tpu.vector_store %arg10[%c48, %c0_15], %15 {strides = array<i32>} : memref<144x512xbf16, #tpu.memory_space<vmem>>, vector<16x512xbf16>,
    %c0_16 = arith.constant 0 : index
    %c0_17 = arith.constant 0 : index
    %c33 = arith.constant 33 : index
    %17 = vector.load %arg1[%c0_16, %c0_17, %c33] : memref<1x16x640xf32, #tpu.memory_space<vmem>>, vector<1x16x512xf32>
    %18 = vector.shape_cast %17 : vector<1x16x512xf32> to vector<16x512xf32>
    %19 = arith.truncf %18 : vector<16x512xf32> to vector<16x512xbf16>
    %c64 = arith.constant 64 : index
    %c0_18 = arith.constant 0 : index
    %20 = vector.load %arg10[%c64, %c0_18] : memref<144x512xbf16, #tpu.memory_space<vmem>>, vector<16x512xbf16>
    tpu.vector_store %arg10[%c64, %c0_18], %19 {strides = array<i32>} : memref<144x512xbf16, #tpu.memory_space<vmem>>, vector<16x512xbf16>,
    %c0_19 = arith.constant 0 : index
    %c0_20 = arith.constant 0 : index
    %c34 = arith.constant 34 : index
    %21 = vector.load %arg1[%c0_19, %c0_20, %c34] : memref<1x16x640xf32, #tpu.memory_space<vmem>>, vector<1x16x512xf32>
    %22 = vector.shape_cast %21 : vector<1x16x512xf32> to vector<16x512xf32>
    %23 = arith.truncf %22 : vector<16x512xf32> to vector<16x512xbf16>
    %c80 = arith.constant 80 : index
    %c0_21 = arith.constant 0 : index
    %24 = vector.load %arg10[%c80, %c0_21] : memref<144x512xbf16, #tpu.memory_space<vmem>>, vector<16x512xbf16>
    tpu.vector_store %arg10[%c80, %c0_21], %23 {strides = array<i32>} : memref<144x512xbf16, #tpu.memory_space<vmem>>, vector<16x512xbf16>,
    %c0_22 = arith.constant 0 : index
    %c0_23 = arith.constant 0 : index
    %c64_24 = arith.constant 64 : index
    %25 = vector.load %arg1[%c0_22, %c0_23, %c64_24] : memref<1x16x640xf32, #tpu.memory_space<vmem>>, vector<1x16x512xf32>
    %26 = vector.shape_cast %25 : vector<1x16x512xf32> to vector<16x512xf32>
    %27 = arith.truncf %26 : vector<16x512xf32> to vector<16x512xbf16>
    %c96 = arith.constant 96 : index
    %c0_25 = arith.constant 0 : index
    %28 = vector.load %arg10[%c96, %c0_25] : memref<144x512xbf16, #tpu.memory_space<vmem>>, vector<16x512xbf16>
    tpu.vector_store %arg10[%c96, %c0_25], %27 {strides = array<i32>} : memref<144x512xbf16, #tpu.memory_space<vmem>>, vector<16x512xbf16>,
    %c0_26 = arith.constant 0 : index
    %c0_27 = arith.constant 0 : index
    %c65 = arith.constant 65 : index
    %29 = vector.load %arg1[%c0_26, %c0_27, %c65] : memref<1x16x640xf32, #tpu.memory_space<vmem>>, vector<1x16x512xf32>
    %30 = vector.shape_cast %29 : vector<1x16x512xf32> to vector<16x512xf32>
    %31 = arith.truncf %30 : vector<16x512xf32> to vector<16x512xbf16>
    %c112 = arith.constant 112 : index
    %c0_28 = arith.constant 0 : index
    %32 = vector.load %arg10[%c112, %c0_28] : memref<144x512xbf16, #tpu.memory_space<vmem>>, vector<16x512xbf16>
    tpu.vector_store %arg10[%c112, %c0_28], %31 {strides = array<i32>} : memref<144x512xbf16, #tpu.memory_space<vmem>>, vector<16x512xbf16>,
    %c0_29 = arith.constant 0 : index
    %c0_30 = arith.constant 0 : index
    %c66 = arith.constant 66 : index
    %33 = vector.load %arg1[%c0_29, %c0_30, %c66] : memref<1x16x640xf32, #tpu.memory_space<vmem>>, vector<1x16x512xf32>
    %34 = vector.shape_cast %33 : vector<1x16x512xf32> to vector<16x512xf32>
    %35 = arith.truncf %34 : vector<16x512xf32> to vector<16x512xbf16>
    %c128 = arith.constant 128 : index
    %c0_31 = arith.constant 0 : index
    %36 = vector.load %arg10[%c128, %c0_31] : memref<144x512xbf16, #tpu.memory_space<vmem>>, vector<16x512xbf16>
    tpu.vector_store %arg10[%c128, %c0_31], %35 {strides = array<i32>} : memref<144x512xbf16, #tpu.memory_space<vmem>>, vector<16x512xbf16>,
    %c0_32 = arith.constant 0 : index
    %c0_33 = arith.constant 0 : index
    %37 = vector.load %arg2[%c0_32, %c0_33] : memref<16x144xbf16, #tpu.memory_space<vmem>>, vector<16x144xbf16>
    %c0_34 = arith.constant 0 : index
    %c0_35 = arith.constant 0 : index
    %38 = vector.load %arg10[%c0_34, %c0_35] : memref<144x512xbf16, #tpu.memory_space<vmem>>, vector<144x512xbf16>
    %cst = arith.constant dense<0.000000e+00> : vector<16x512xf32>
    %39 = tpu.matmul %37, %38, %cst {dimension_numbers = #tpu.dot_dimension_numbers<[1], [0], [0], [1], [0, 0, 1, 1], [], []>} : vector<16x144xbf16>, vector<144x512xbf16>, vector<16x512xf32> -> vector<16x512xf32>
    %c0_36 = arith.constant 0 : index
    %c0_37 = arith.constant 0 : index
    %40 = vector.load %arg3[%c0_36, %c0_37] : memref<16x1xf32, #tpu.memory_space<vmem>>, vector<16x1xf32>
    %41 = vector.broadcast %40 : vector<16x1xf32> to vector<16x512xf32>
    %42 = arith.addf %39, %41 : vector<16x512xf32>
    %cst_38 = arith.constant 0.000000e+00 : f32
    %43 = vector.broadcast %cst_38 : f32 to vector<16x512xf32>
    %44 = arith.maximumf %42, %43 : vector<16x512xf32>
    %45 = vector.broadcast %0 : vector<1x512xf32> to vector<16x512xf32>
    %46 = arith.mulf %44, %45 : vector<16x512xf32>
    %cst_39 = arith.constant 0.000000e+00 : bf16
    %47 = vector.broadcast %cst_39 : bf16 to vector<16x640xbf16>
    %c0_40 = arith.constant 0 : index
    %c0_41 = arith.constant 0 : index
    %48 = vector.load %arg11[%c0_40, %c0_41] : memref<16x640xbf16, #tpu.memory_space<vmem>>, vector<16x640xbf16>
    tpu.vector_store %arg11[%c0_40, %c0_41], %47 {strides = array<i32>} : memref<16x640xbf16, #tpu.memory_space<vmem>>, vector<16x640xbf16>,
    %49 = arith.truncf %46 : vector<16x512xf32> to vector<16x512xbf16>
    %c0_42 = arith.constant 0 : index
    %c33_43 = arith.constant 33 : index
    %50 = vector.load %arg11[%c0_42, %c33_43] : memref<16x640xbf16, #tpu.memory_space<vmem>>, vector<16x512xbf16>
    tpu.vector_store %arg11[%c0_42, %c33_43], %49 {strides = array<i32>} : memref<16x640xbf16, #tpu.memory_space<vmem>>, vector<16x512xbf16>,
    %c0_44 = arith.constant 0 : index
    %c0_45 = arith.constant 0 : index
    %51 = vector.load %arg11[%c0_44, %c0_45] : memref<16x640xbf16, #tpu.memory_space<vmem>>, vector<16x512xbf16>
    %c0_46 = arith.constant 0 : index
    %c0_47 = arith.constant 0 : index
    %52 = vector.load %arg10[%c0_46, %c0_47] : memref<144x512xbf16, #tpu.memory_space<vmem>>, vector<16x512xbf16>
    tpu.vector_store %arg10[%c0_46, %c0_47], %51 {strides = array<i32>} : memref<144x512xbf16, #tpu.memory_space<vmem>>, vector<16x512xbf16>,
    %c0_48 = arith.constant 0 : index
    %c1_49 = arith.constant 1 : index
    %53 = vector.load %arg11[%c0_48, %c1_49] : memref<16x640xbf16, #tpu.memory_space<vmem>>, vector<16x512xbf16>
    %c16_50 = arith.constant 16 : index
    %c0_51 = arith.constant 0 : index
    %54 = vector.load %arg10[%c16_50, %c0_51] : memref<144x512xbf16, #tpu.memory_space<vmem>>, vector<16x512xbf16>
    tpu.vector_store %arg10[%c16_50, %c0_51], %53 {strides = array<i32>} : memref<144x512xbf16, #tpu.memory_space<vmem>>, vector<16x512xbf16>,
    %c0_52 = arith.constant 0 : index
    %c2_53 = arith.constant 2 : index
    %55 = vector.load %arg11[%c0_52, %c2_53] : memref<16x640xbf16, #tpu.memory_space<vmem>>, vector<16x512xbf16>
    %c32_54 = arith.constant 32 : index
    %c0_55 = arith.constant 0 : index
    %56 = vector.load %arg10[%c32_54, %c0_55] : memref<144x512xbf16, #tpu.memory_space<vmem>>, vector<16x512xbf16>
    tpu.vector_store %arg10[%c32_54, %c0_55], %55 {strides = array<i32>} : memref<144x512xbf16, #tpu.memory_space<vmem>>, vector<16x512xbf16>,
    %c0_56 = arith.constant 0 : index
    %c32_57 = arith.constant 32 : index
    %57 = vector.load %arg11[%c0_56, %c32_57] : memref<16x640xbf16, #tpu.memory_space<vmem>>, vector<16x512xbf16>
    %c48_58 = arith.constant 48 : index
    %c0_59 = arith.constant 0 : index
    %58 = vector.load %arg10[%c48_58, %c0_59] : memref<144x512xbf16, #tpu.memory_space<vmem>>, vector<16x512xbf16>
    tpu.vector_store %arg10[%c48_58, %c0_59], %57 {strides = array<i32>} : memref<144x512xbf16, #tpu.memory_space<vmem>>, vector<16x512xbf16>,
    %c0_60 = arith.constant 0 : index
    %c33_61 = arith.constant 33 : index
    %59 = vector.load %arg11[%c0_60, %c33_61] : memref<16x640xbf16, #tpu.memory_space<vmem>>, vector<16x512xbf16>
    %c64_62 = arith.constant 64 : index
    %c0_63 = arith.constant 0 : index
    %60 = vector.load %arg10[%c64_62, %c0_63] : memref<144x512xbf16, #tpu.memory_space<vmem>>, vector<16x512xbf16>
    tpu.vector_store %arg10[%c64_62, %c0_63], %59 {strides = array<i32>} : memref<144x512xbf16, #tpu.memory_space<vmem>>, vector<16x512xbf16>,
    %c0_64 = arith.constant 0 : index
    %c34_65 = arith.constant 34 : index
    %61 = vector.load %arg11[%c0_64, %c34_65] : memref<16x640xbf16, #tpu.memory_space<vmem>>, vector<16x512xbf16>
    %c80_66 = arith.constant 80 : index
    %c0_67 = arith.constant 0 : index
    %62 = vector.load %arg10[%c80_66, %c0_67] : memref<144x512xbf16, #tpu.memory_space<vmem>>, vector<16x512xbf16>
    tpu.vector_store %arg10[%c80_66, %c0_67], %61 {strides = array<i32>} : memref<144x512xbf16, #tpu.memory_space<vmem>>, vector<16x512xbf16>,
    %c0_68 = arith.constant 0 : index
    %c64_69 = arith.constant 64 : index
    %63 = vector.load %arg11[%c0_68, %c64_69] : memref<16x640xbf16, #tpu.memory_space<vmem>>, vector<16x512xbf16>
    %c96_70 = arith.constant 96 : index
    %c0_71 = arith.constant 0 : index
    %64 = vector.load %arg10[%c96_70, %c0_71] : memref<144x512xbf16, #tpu.memory_space<vmem>>, vector<16x512xbf16>
    tpu.vector_store %arg10[%c96_70, %c0_71], %63 {strides = array<i32>} : memref<144x512xbf16, #tpu.memory_space<vmem>>, vector<16x512xbf16>,
    %c0_72 = arith.constant 0 : index
    %c65_73 = arith.constant 65 : index
    %65 = vector.load %arg11[%c0_72, %c65_73] : memref<16x640xbf16, #tpu.memory_space<vmem>>, vector<16x512xbf16>
    %c112_74 = arith.constant 112 : index
    %c0_75 = arith.constant 0 : index
    %66 = vector.load %arg10[%c112_74, %c0_75] : memref<144x512xbf16, #tpu.memory_space<vmem>>, vector<16x512xbf16>
    tpu.vector_store %arg10[%c112_74, %c0_75], %65 {strides = array<i32>} : memref<144x512xbf16, #tpu.memory_space<vmem>>, vector<16x512xbf16>,
    %c0_76 = arith.constant 0 : index
    %c66_77 = arith.constant 66 : index
    %67 = vector.load %arg11[%c0_76, %c66_77] : memref<16x640xbf16, #tpu.memory_space<vmem>>, vector<16x512xbf16>
    %c128_78 = arith.constant 128 : index
    %c0_79 = arith.constant 0 : index
    %68 = vector.load %arg10[%c128_78, %c0_79] : memref<144x512xbf16, #tpu.memory_space<vmem>>, vector<16x512xbf16>
    tpu.vector_store %arg10[%c128_78, %c0_79], %67 {strides = array<i32>} : memref<144x512xbf16, #tpu.memory_space<vmem>>, vector<16x512xbf16>,
    %c0_80 = arith.constant 0 : index
    %c0_81 = arith.constant 0 : index
    %69 = vector.load %arg4[%c0_80, %c0_81] : memref<16x144xbf16, #tpu.memory_space<vmem>>, vector<16x144xbf16>
    %c0_82 = arith.constant 0 : index
    %c0_83 = arith.constant 0 : index
    %70 = vector.load %arg10[%c0_82, %c0_83] : memref<144x512xbf16, #tpu.memory_space<vmem>>, vector<144x512xbf16>
    %cst_84 = arith.constant dense<0.000000e+00> : vector<16x512xf32>
    %71 = tpu.matmul %69, %70, %cst_84 {dimension_numbers = #tpu.dot_dimension_numbers<[1], [0], [0], [1], [0, 0, 1, 1], [], []>} : vector<16x144xbf16>, vector<144x512xbf16>, vector<16x512xf32> -> vector<16x512xf32>
    %c0_85 = arith.constant 0 : index
    %c0_86 = arith.constant 0 : index
    %72 = vector.load %arg5[%c0_85, %c0_86] : memref<16x1xf32, #tpu.memory_space<vmem>>, vector<16x1xf32>
    %73 = vector.broadcast %72 : vector<16x1xf32> to vector<16x512xf32>
    %74 = arith.addf %71, %73 : vector<16x512xf32>
    %75 = vector.broadcast %0 : vector<1x512xf32> to vector<16x512xf32>
    %76 = arith.mulf %74, %75 : vector<16x512xf32>
    %cst_87 = arith.constant dense<0.000000e+00> : vector<16xf32>
    %77 = vector.multi_reduction <add>, %76, %cst_87 [1] : vector<16x512xf32> to vector<16xf32>
    %78 = vector.shape_cast %77 : vector<16xf32> to vector<16x1xf32>
    %cst_88 = arith.constant 0.00208333344 : f32
    %79 = vector.broadcast %cst_88 : f32 to vector<16x1xf32>
    %80 = arith.mulf %78, %79 : vector<16x1xf32>
    %81 = vector.broadcast %80 : vector<16x1xf32> to vector<16x512xf32>
    %82 = arith.subf %74, %81 : vector<16x512xf32>
    %83 = vector.broadcast %0 : vector<1x512xf32> to vector<16x512xf32>
    %84 = arith.mulf %82, %83 : vector<16x512xf32>
    %85 = arith.mulf %84, %84 : vector<16x512xf32>
    %cst_89 = arith.constant dense<0.000000e+00> : vector<16xf32>
    %86 = vector.multi_reduction <add>, %85, %cst_89 [1] : vector<16x512xf32> to vector<16xf32>
    %87 = vector.shape_cast %86 : vector<16xf32> to vector<16x1xf32>
    %cst_90 = arith.constant 0.00208333344 : f32
    %88 = vector.broadcast %cst_90 : f32 to vector<16x1xf32>
    %89 = arith.mulf %87, %88 : vector<16x1xf32>
    %90 = vector.broadcast %80 : vector<16x1xf32> to vector<16x512xf32>
    %91 = arith.subf %74, %90 : vector<16x512xf32>
    %cst_91 = arith.constant 9.99999974E-6 : f32
    %92 = vector.broadcast %cst_91 : f32 to vector<16x1xf32>
    %93 = arith.addf %89, %92 : vector<16x1xf32>
    %94 = math.rsqrt %93 : vector<16x1xf32>
    %95 = vector.broadcast %94 : vector<16x1xf32> to vector<16x512xf32>
    %96 = arith.mulf %91, %95 : vector<16x512xf32>
    %c0_92 = arith.constant 0 : index
    %c0_93 = arith.constant 0 : index
    %97 = vector.load %arg6[%c0_92, %c0_93] : memref<16x1xf32, #tpu.memory_space<vmem>>, vector<16x1xf32>
    %98 = vector.broadcast %97 : vector<16x1xf32> to vector<16x512xf32>
    %99 = arith.mulf %96, %98 : vector<16x512xf32>
    %c0_94 = arith.constant 0 : index
    %c0_95 = arith.constant 0 : index
    %100 = vector.load %arg7[%c0_94, %c0_95] : memref<16x1xf32, #tpu.memory_space<vmem>>, vector<16x1xf32>
    %101 = vector.broadcast %100 : vector<16x1xf32> to vector<16x512xf32>
    %102 = arith.addf %99, %101 : vector<16x512xf32>
    %c0_96 = arith.constant 0 : index
    %c0_97 = arith.constant 0 : index
    %c33_98 = arith.constant 33 : index
    %103 = vector.load %arg1[%c0_96, %c0_97, %c33_98] : memref<1x16x640xf32, #tpu.memory_space<vmem>>, vector<1x16x512xf32>
    %104 = vector.shape_cast %103 : vector<1x16x512xf32> to vector<16x512xf32>
    %105 = arith.addf %102, %104 : vector<16x512xf32>
    %cst_99 = arith.constant 0.000000e+00 : f32
    %106 = vector.broadcast %cst_99 : f32 to vector<16x512xf32>
    %107 = arith.maximumf %105, %106 : vector<16x512xf32>
    %c0_100 = arith.constant 0 : index
    %c0_101 = arith.constant 0 : index
    %c0_102 = arith.constant 0 : index
    %108 = vector.load %arg9[%c0_100, %c0_101, %c0_102] : memref<1x16x512xf32, #tpu.memory_space<vmem>>, vector<1x16x512xf32>
    %109 = vector.shape_cast %108 : vector<1x16x512xf32> to vector<16x512xf32>
    %110 = vector.shape_cast %107 : vector<16x512xf32> to vector<1x16x512xf32>
    tpu.vector_store %arg9[%c0_100, %c0_101, %c0_102], %110 {strides = array<i32>} : memref<1x16x512xf32, #tpu.memory_space<vmem>>, vector<1x16x512xf32>,
    return
  }
  func.func @transform_0(%arg0: i32) -> (i32, i32, i32) {
    %c0_i32 = arith.constant 0 : i32
    %c0_i32_0 = arith.constant 0 : i32
    %c0_i32_1 = arith.constant 0 : i32
    return %arg0, %c0_i32, %c0_i32_0 : i32, i32, i32
  }
  func.func @transform_1(%arg0: i32) -> (i32, i32) {
    %c0_i32 = arith.constant 0 : i32
    %c0_i32_0 = arith.constant 0 : i32
    %c0_i32_1 = arith.constant 0 : i32
    return %c0_i32, %c0_i32_0 : i32, i32
  }
  func.func @transform_2(%arg0: i32) -> (i32, i32) {
    %c0_i32 = arith.constant 0 : i32
    %c0_i32_0 = arith.constant 0 : i32
    %c0_i32_1 = arith.constant 0 : i32
    return %c0_i32, %c0_i32_0 : i32, i32
  }
  func.func @transform_3(%arg0: i32) -> (i32, i32) {
    %c0_i32 = arith.constant 0 : i32
    %c0_i32_0 = arith.constant 0 : i32
    %c0_i32_1 = arith.constant 0 : i32
    return %c0_i32, %c0_i32_0 : i32, i32
  }
  func.func @transform_4(%arg0: i32) -> (i32, i32) {
    %c0_i32 = arith.constant 0 : i32
    %c0_i32_0 = arith.constant 0 : i32
    %c0_i32_1 = arith.constant 0 : i32
    return %c0_i32, %c0_i32_0 : i32, i32
  }
  func.func @transform_5(%arg0: i32) -> (i32, i32) {
    %c0_i32 = arith.constant 0 : i32
    %c0_i32_0 = arith.constant 0 : i32
    %c0_i32_1 = arith.constant 0 : i32
    return %c0_i32, %c0_i32_0 : i32, i32
  }
  func.func @transform_6(%arg0: i32) -> (i32, i32) {
    %c0_i32 = arith.constant 0 : i32
    %c0_i32_0 = arith.constant 0 : i32
    %c0_i32_1 = arith.constant 0 : i32
    return %c0_i32, %c0_i32_0 : i32, i32
  }
  func.func @transform_7(%arg0: i32) -> (i32, i32) {
    %c0_i32 = arith.constant 0 : i32
    %c0_i32_0 = arith.constant 0 : i32
    %c0_i32_1 = arith.constant 0 : i32
    return %c0_i32, %c0_i32_0 : i32, i32
  }
  func.func @transform_8(%arg0: i32) -> (i32, i32, i32) {
    %c0_i32 = arith.constant 0 : i32
    %c0_i32_0 = arith.constant 0 : i32
    %c0_i32_1 = arith.constant 0 : i32
    return %arg0, %c0_i32, %c0_i32_0 : i32, i32, i32
  }
}

</mosaic_0001>

<bundles_post_ra>
// kernel: tpu_custom_call.1
= control target key start
LH: loop header
LB: loop body
LE: loop exit
PB: predicated region body
PF: predicated region fallthrough
CT: control target
= control target key end

     0   :  { %13 = vsyncpa [#allocation5], 0  ;;  %s2336_s0 = inlined_call_operand.hbm [shape: f32[2,16,640], index: 0, kind: input, shape index: {}]   ;;  %s2337_s1 = inlined_call_operand.vmem [shape: bf16[16,144], index: 1, kind: input, shape index: {}]   ;;  %s2338_s2 = inlined_call_operand.vmem [shape: f32[16,1], index: 2, kind: input, shape index: {}]   ;;  %s2339_s3 = inlined_call_operand.vmem [shape: bf16[16,144], index: 3, kind: input, shape index: {}]   ;;  %s2340_s4 = inlined_call_operand.vmem [shape: f32[16,1], index: 4, kind: input, shape index: {}]   ;;  %s2341_s5 = inlined_call_operand.vmem [shape: f32[16,1], index: 5, kind: input, shape index: {}]   ;;  %s2342_s6 = inlined_call_operand.vmem [shape: f32[16,1], index: 6, kind: input, shape index: {}]   ;;  %s2343_s7 = inlined_call_operand.vmem [shape: f32[1,512], index: 7, kind: input, shape index: {}]   ;;  %s2344_s8 = inlined_call_operand.hbm [shape: f32[2,16,512], index: 8, kind: output, shape index: {}]  }
   0x1   :  { %15 = vsyncpa [#allocation5 + $0x1], 0 }
   0x2   :  { %16 = vsyncpa [#allocation6], 0 }
   0x3   :  { %18 = vsyncpa [#allocation6 + $0x1], 0  ;;  %s1851_s27 = smov 0   ;;  %s1853_s28 = smov 0  }
   0x4   :  { %s1855_s29 = smov 0   ;;  %s1857_s30 = smov 0  }
   0x5 LB: > { %s1872_s9 = sadd.s32 4294967295, %s1788_s30   ;;  %s1597_s10 = sadd.s32 4294967294, %s1788_s30   ;;  %s1788_s30 = sphi %s1857_s30, %s2358_s30   ;;  %s1784_s29 = sphi %s1855_s29, %s2357_s29   ;;  %s1780_s28 = sphi %s1853_s28, %s2356_s28   ;;  %s1776_s27 = sphi %s1851_s27, %s2355_s27  }
   0x6   : > { %s1876_s11 = sadd.s32 1, %s1788_s30   ;;  %s31_s12 = sadd.s32 1, %s1784_s29 }
   0x7   : > { %s28_s13 = ssub.s32 %s1788_s30, %s1876_s11  ;;  %p38_p0 = scmp.ne.s32.totalorder %s1784_s29, %s1780_s28 }
   0x8   : > { %p29_p1 = scmp.eq.s32.totalorder %s28_s13, 0  ;;  %p39_p2 = scmp.eq.s32.totalorder %s1788_s30, 0 }
   0x9   : > { %p44_p3 = scmp.ne.s32.totalorder %s1780_s28, %s1776_s27  ;;  %p45_p4 = scmp.eq.s32.totalorder %s1872_s9, 0 }
   0xa   : > { %s1888_s14 = scalar_select %p29_p1, %s1784_s29, %s31_s12  }
   0xb   : > { %p40_p5 = por %p39_p2, %p38_p0  ;;  %p1890_p6 = por %p45_p4, %p44_p3 }
   0xc   : > { %2346 = sst [smem:[#allocation10_spill]] %s1888_s14  ;;  %p215_p7 = scmp.eq.s32.totalorder %s1872_s9, 1 }
   0xd   : > { %p221_p8 = scmp.eq.s32.totalorder %s1597_s10, 1  ;;  %p1632_p10 = scmp.lt.s32.totalorder %s1788_s30, 2 }
   0xe   : > { %p1897_p11 = por %p215_p7, %p38_p0  ;;  %s262_s18 = sand.u32 1, %s1784_s29  }
   0xf   : > { %p1901_p12 = por %p221_p8, %p44_p3  ;;  %s1618_s19 = smul.u32 1280, %s1788_s30 }
  0x10   : > { %s2348_s16 = scalar_select %p1897_p11, 1, 0 }
  0x11   : > { %s2349_s17 = scalar_select %p1901_p12, 1, 0 }
  0x12   : > { %s1617_s20 = smul.u32 80, %s262_s18  ;;  %s1910_s23 = scalar_lea.hbm %s2336_s0, %s1618_s19 }
  0x13   : > { %p1912_p13 = pnand %p1632_p10, %p40_p5  ;;  %s1918_s10 = scalar_lea.sflag [#allocation5], %s262_s18 }
  0x14   : > { %s266_s25 = scalar_lea.vmem [#allocation4], %s1617_s20  ;;  %s1692_s12 = scalar_lea.hbm %s1910_s23, 1280 }
  0x15   : > { %s273_s26 = sshll.u32 %s266_s25, 4  ;;  %p1693_p0 = scmp.ne.s32.totalorder %s1910_s23, %s1692_s12  ;;  %s1916_s26 = int_to_ptr.vmem [resolvable:$true] %s273_s26 }
  0x16   : > { %p1694_p1 = pneg %p1912_p13  ;;  %s1697_s21 = scalar_lea.hbm %s2336_s0, 2560 }
  0x17   : > { %p1698_p4 = scmp.lt.u32.totalorder %s1910_s23, %s2336_s0  ;;  %p1699_p5 = scmp.lt.u32.totalorder %s1697_s21, %s1692_s12 }
  0x18   : > { %p1695_p2 = pnand %p1694_p1, %p1693_p0  ;;  %p1701_p8 = scmp.lt.u32.totalorder %s1692_s12, %s1910_s23 }
  0x19   : > { %p1700_p7 = por %p1699_p5, %p1698_p4 }
  0x1a   : > { %p1696_p3 = pneg %p1695_p2 }
  0x1b   : > { %p1702_p10 = por %p1701_p8, %p1700_p7 }
  0x1d   : > { %p1703_p9 = pnand %p1702_p10, %p1696_p3 }
  0x1f   : > { %1706 = shalt.err (!%p1703_p9)
}
  0x20   : > { %s1707_s18 = scalar_lea.vmem %s1916_s26, 1280  ;;  %s1790_s20 = smov [#allocation4]  }
  0x21   : > { %p1708_p0 = scmp.ne.s32.totalorder %s1916_s26, %s1707_s18  ;;  %s1712_s25 = sshll.u32 %s1790_s20, 4  ;;  %s1713_s25 = int_to_ptr.vmem [resolvable:$false] %s1712_s25 }
  0x22   : > { %s1714_s14 = scalar_lea.vmem %s1713_s25, 2560  ;;  %p1715_p11 = scmp.lt.s32.totalorder %s1916_s26, %s1713_s25 }
  0x23   : > { %p1710_p2 = pnand %p1708_p0, %p1694_p1  ;;  %p1716_p4 = scmp.lt.s32.totalorder %s1714_s14, %s1707_s18 }
  0x25   : > { %p1711_p12 = pneg %p1710_p2  ;;  %p1717_p5 = por %p1716_p4, %p1715_p11 }
  0x27   : > { %p1718_p7 = pnand %p1717_p5, %p1711_p12 }
  0x29   : > { %1721 = shalt.err (!%p1718_p7)
}
  0x2a   : > { %s1791_s12 = smov 640   ;;  %s1792_s13 = smov 40  }
  0x2b   : > { %1627 = dma.hbm_to_vmem [thread:$0]  (!%p1912_p13), %s1910_s23, 1280, %s1916_s26, %s1918_s10, %s1791_s12, %s1791_s12, %s1792_s13  }
  0x2c   : > { %p1601_p9 = scmp.ge.s32.totalorder %s1788_s30, 1  ;;  %p281_p1 = scmp.lt.s32.totalorder %s1788_s30, 3 }
  0x2e   : > { %p282_p3 = pnand %p1601_p9, %p281_p1 }
  0x2f   : > { %s1949_s19 = sand.u32 (!%p282_p3), 1, %s1780_s28  }
  0x30   : > { %285 = sbr.rel (%p282_p3) target bundleno = 1354 (0x54a), region = 52  ;;  %s288_s22 = scalar_lea.sflag (!%p282_p3), [#allocation5], %s1949_s19 }
  0x31   : > { %s1619_s21 = smul.u32 (!%p282_p3), 80, %s1949_s19 }
  0x33   : > { %s1953_s18 = scalar_lea.vmem (!%p282_p3), [#allocation4], %s1619_s21 }
  0x37   : > { %1767 = dma.done.wait (%p1890_p6), %s288_s22, 1280  }
  0x38   : > { %1769 = vsyncadd (%p1890_p6), %s288_s22, 4294966016  ;;  %v343_v0 = vld [vmem:[%s1953_s18 + $0x8] sm:$0xff]  ;;  %v348_v1 = vld [vmem:[%s1953_s18 + $0x30] sm:$0xff]  ;;  %s1793_s15 = smov 127   ;;  %s1794_s23 = smov 126   ;;  %vm745_vm0 = vcmask 130048  }
  0x39   : > { %v342_v2 = vld [vmem:[%s1953_s18] sm:$0xff]  ;;  %v353_v3 = vpack.c.bf16 %v348_v1, %v343_v0  ;;  %v347_v4 = vld [vmem:[%s1953_s18 + $0x28] sm:$0xff]  ;;  %v344_v5 = vld [vmem:[%s1953_s18 + $0x10] sm:$0xff]  ;;  %s1795_s24 = smov 96   ;;  %s1796_s26 = smov 95   ;;  %v1801_v16 = vmov 0  }
  0x3a   : > { %v349_v6 = vld [vmem:[%s1953_s18 + $0x38] sm:$0xff]  ;;  %v1965_v7 = vpack.c.bf16 %v347_v4, %v342_v2  ;;  %v350_v9 = vld [vmem:[%s1953_s18 + $0x40] sm:$0xff]  ;;  %v351_v13 = vld [vmem:[%s1953_s18 + $0x48] sm:$0xff]  ;;  %s1797_s10 = smov 94   ;;  %s1798_s20 = smov 64   ;;  %1680 = vset.pattern.permute.xlu0 %v1801_v16  ;;  %872 = vst [vmem:[#allocation3] sm:$0xff] %v1801_v16  ;;  %1681 = vset.pattern.permute.xlu1 %v1801_v16 }
  0x3b   : > { %v345_v8 = vld [vmem:[%s1953_s18 + $0x18] sm:$0xff]  ;;  %364 = vrot.lane.b32.xlu0 %v353_v3, %s1793_s15  ;;  %v354_v10 = vpack.c.bf16 %v349_v6, %v344_v5  ;;  %v346_v12 = vld [vmem:[%s1953_s18 + $0x20] sm:$0xff]  ;;  %749 = vmatprep.subr.bf16.mxu0 %v353_v3  ;;  %s1799_s25 = smov 63   ;;  %s1800_s13 = smov 62   ;;  %876 = vst [vmem:[#allocation3 + $0x20] sm:$0xff] %v1801_v16  ;;  %vm372_vm1 = vcmask 1039360  }
  0x3c   : > { %v355_v11 = vpack.c.bf16 %v350_v9, %v345_v8  ;;  %362 = vrot.lane.b32.xlu1 %v1965_v7, %s1793_s15  ;;  %750 = vmatpush1.bf16.msra.mxu0 %v1965_v7  ;;  %v356_v14 = vpack.c.bf16 %v351_v13, %v346_v12  ;;  %v1684_v15 = vld [vmem:[%s2337_s1 + $0x4] ss:$8 sps:$4 sm:$0xff]   ;;  %vm415_vm2 = vcmask 1031168   ;;  %vm458_vm3 = vcmask 785408   ;;  %s1802_s21 = smov 33   ;;  %s1511_s12 = scalar_lea.sflag [#allocation6], %s1949_s19 }
  0x3d   : > { %1605 = vmatprep.mubr.msk.bf16.mxu0 %vm745_vm0, %v1684_v15  ;;  %1606 = vmatprep.mubr.msk.bf16.mxu1 %vm745_vm0, %v1684_v15  ;;  %v724_v17 = vld [vmem:[%s2338_s2] sm:$0xff]  ;;  %v725_v18 = vld [vmem:[%s2338_s2 + $0x8] sm:$0xff]  ;;  %vm501_vm4 = vcmask 777216   ;;  %vm544_vm5 = vcmask 769024   ;;  %vm587_vm6 = vcmask 523264   ;;  %vm630_vm7 = vcmask 515072  }
  0x3e   : > { %792 = vmatprep.subr.bf16.mxu1 %v355_v11  ;;  %vm673_vm8 = vcmask 506880   ;;  %vm902_vm9 = vcmask 1047816   ;;  %vm893_vm10 = vcmask 269312   ;;  %p2351_p11 = scmp.ne.s32.totalorder %s2348_s16, 0 }
  0x3f   : > { %793 = vmatpush1.bf16.msra.mxu1 %v354_v10  ;;  %366 = vrot.lane.b32.xlu0 %v354_v10, %s1793_s15 }
  0x40   : > { %368 = vrot.lane.b32.xlu1 %v355_v11, %s1793_s15 }
  0x43   : > { %370 = vrot.lane.b32.xlu0 %v356_v14, %s1793_s15 }
  0x44   : > { %407 = vrot.lane.b32.xlu1 %v353_v3, %s1794_s23 }
  0x47   : > { %409 = vrot.lane.b32.xlu0 %v354_v10, %s1794_s23 }
  0x48   : > { %405 = vrot.lane.b32.xlu1 %v1965_v7, %s1794_s23 }
  0x4b   : > { %411 = vrot.lane.b32.xlu0 %v355_v11, %s1794_s23 }
  0x4c   : > { %413 = vrot.lane.b32.xlu1 %v356_v14, %s1794_s23 }
  0x4f   : > { %450 = vrot.lane.b32.xlu0 %v353_v3, %s1795_s24 }
  0x50   : > { %452 = vrot.lane.b32.xlu1 %v354_v10, %s1795_s24 }
  0x53   : > { %448 = vrot.lane.b32.xlu0 %v1965_v7, %s1795_s24 }
  0x54   : > { %454 = vrot.lane.b32.xlu1 %v355_v11, %s1795_s24 }
  0x57   : > { %456 = vrot.lane.b32.xlu0 %v356_v14, %s1795_s24 }
  0x58   : > { %493 = vrot.lane.b32.xlu1 %v353_v3, %s1796_s26 }
  0x5b   : > { %495 = vrot.lane.b32.xlu0 %v354_v10, %s1796_s26 }
  0x5c   : > { %491 = vrot.lane.b32.xlu1 %v1965_v7, %s1796_s26 }
  0x5f   : > { %497 = vrot.lane.b32.xlu0 %v355_v11, %s1796_s26 }
  0x60   : > { %499 = vrot.lane.b32.xlu1 %v356_v14, %s1796_s26 }
  0x63   : > { %536 = vrot.lane.b32.xlu0 %v353_v3, %s1797_s10 }
  0x64   : > { %538 = vrot.lane.b32.xlu1 %v354_v10, %s1797_s10 }
  0x67   : > { %534 = vrot.lane.b32.xlu0 %v1965_v7, %s1797_s10 }
  0x68   : > { %540 = vrot.lane.b32.xlu1 %v355_v11, %s1797_s10 }
  0x6b   : > { %542 = vrot.lane.b32.xlu0 %v356_v14, %s1797_s10 }
  0x6c   : > { %579 = vrot.lane.b32.xlu1 %v353_v3, %s1798_s20 }
  0x6f   : > { %581 = vrot.lane.b32.xlu0 %v354_v10, %s1798_s20 }
  0x70   : > { %577 = vrot.lane.b32.xlu1 %v1965_v7, %s1798_s20 }
  0x73   : > { %583 = vrot.lane.b32.xlu0 %v355_v11, %s1798_s20 }
  0x74   : > { %585 = vrot.lane.b32.xlu1 %v356_v14, %s1798_s20 }
  0x77   : > { %622 = vrot.lane.b32.xlu0 %v353_v3, %s1799_s25 }
  0x78   : > { %624 = vrot.lane.b32.xlu1 %v354_v10, %s1799_s25 }
  0x7b   : > { %620 = vrot.lane.b32.xlu0 %v1965_v7, %s1799_s25 }
  0x7c   : > { %626 = vrot.lane.b32.xlu1 %v355_v11, %s1799_s25 }
  0x7f   : > { %628 = vrot.lane.b32.xlu0 %v356_v14, %s1799_s25 }
  0x80   : > { %665 = vrot.lane.b32.xlu1 %v353_v3, %s1800_s13 }
  0x83   : > { %667 = vrot.lane.b32.xlu0 %v354_v10, %s1800_s13 }
  0x84   : > { %663 = vrot.lane.b32.xlu1 %v1965_v7, %s1800_s13 }
  0x87   : > { %669 = vrot.lane.b32.xlu0 %v355_v11, %s1800_s13 }
  0x88   : > { %671 = vrot.lane.b32.xlu1 %v356_v14, %s1800_s13 }
  0x8b   : > { %728 = vperm.xlu0 %1680, %v724_v17  }
  0x8c   : > { %733 = vperm.xlu1 %1681, %v725_v18  }
  0xad   : > { %v365_v19 = vpop.permute.xlu0 %364 }
  0xae   : > { %v363_v20 = vpop.permute.xlu1 %362 }
  0xaf   : > { %v373_v24 = vsel %vm372_vm1, %v363_v20, %v365_v19 }
  0xb1   : > { %v367_v21 = vpop.permute.xlu0 %366 }
  0xb2   : > { %v369_v22 = vpop.permute.xlu1 %368  ;;  %v374_v23 = vsel %vm372_vm1, %v365_v19, %v367_v21 }
  0xb3   : > { %751 = vmatprep.subr.bf16.mxu0 %v374_v23  ;;  %v375_v28 = vsel %vm372_vm1, %v367_v21, %v369_v22  ;;  %v1682_v23 = vld [vmem:[%s2337_s1] ss:$8 sps:$4 sm:$0xff]  }
  0xb4   : > { %752 = vmatpush1.bf16.msra.mxu0 %v373_v24 }
  0xb5   : > { %v371_v25 = vpop.permute.xlu0 %370 }
  0xb6   : > { %v408_v26 = vpop.permute.xlu1 %407  ;;  %v376_v27 = vsel %vm372_vm1, %v369_v22, %v371_v25 }
  0xb7   : > { %794 = vmatprep.subr.bf16.mxu1 %v376_v27 }
  0xb8   : > { %795 = vmatpush1.bf16.msra.mxu1 %v375_v28  ;;  %v844_v28 = vlaneseq }
  0xb9   : > { %v410_v29 = vpop.permute.xlu0 %409 }
  0xba   : > { %v406_v30 = vpop.permute.xlu1 %405  ;;  %v417_v31 = vsel %vm415_vm2, %v408_v26, %v410_v29 }
  0xbb   : > { %753 = vmatprep.subr.bf16.mxu0 %v417_v31  ;;  %v416_v32 = vsel %vm415_vm2, %v406_v30, %v408_v26 }
  0xbc   : > { %754 = vmatpush1.bf16.msra.mxu0 %v416_v32  ;;  %v325_v32 = vld [vmem:[%s2343_s7] sm:$0xf] }
  0xbd   : > { %v412_v33 = vpop.permute.xlu0 %411 }
  0xbe   : > { %v414_v34 = vpop.permute.xlu1 %413  ;;  %v418_v35 = vsel %vm415_vm2, %v410_v29, %v412_v33  ;;  %v845_v29 = vshrl.u32 %v844_v28, 7 }
  0xbf   : > { %v419_v36 = vsel %vm415_vm2, %v412_v33, %v414_v34 }
  0xc0   : > { %796 = vmatprep.subr.bf16.mxu1 %v419_v36  ;;  %v846_v31 = vsub.s32 0, %v845_v29  ;;  %v850_v34 = vsub.s32 1, %v845_v29 }
  0xc1   : > { %797 = vmatpush1.bf16.msra.mxu1 %v418_v35  ;;  %v451_v37 = vpop.permute.xlu0 %450 }
  0xc2   : > { %v453_v38 = vpop.permute.xlu1 %452 }
  0xc3   : > { %v460_v39 = vsel %vm458_vm3, %v451_v37, %v453_v38 }
  0xc4   : > { %755 = vmatprep.subr.bf16.mxu0 %v460_v39 }
  0xc5   : > { %v449_v40 = vpop.permute.xlu0 %448 }
  0xc6   : > { %v455_v41 = vpop.permute.xlu1 %454  ;;  %v459_v42 = vsel %vm458_vm3, %v449_v40, %v451_v37 }
  0xc7   : > { %756 = vmatpush1.bf16.msra.mxu0 %v459_v42  ;;  %v461_v46 = vsel %vm458_vm3, %v453_v38, %v455_v41 }
  0xc9   : > { %v457_v43 = vpop.permute.xlu0 %456 }
  0xca   : > { %v494_v44 = vpop.permute.xlu1 %493  ;;  %v462_v45 = vsel %vm458_vm3, %v455_v41, %v457_v43  ;;  %v2069_v41 = vrot.slane %v325_v32, %v846_v31 }
  0xcb   : > { %798 = vmatprep.subr.bf16.mxu1 %v462_v45 }
  0xcc   : > { %799 = vmatpush1.bf16.msra.mxu1 %v461_v46  ;;  %v2071_v46 = vrot.slane %v325_v32, %v850_v34 }
  0xcd   : > { %v496_v47 = vpop.permute.xlu0 %495 }
  0xce   : > { %v492_v48 = vpop.permute.xlu1 %491  ;;  %v503_v49 = vsel %vm501_vm4, %v494_v44, %v496_v47 }
  0xcf   : > { %757 = vmatprep.subr.bf16.mxu0 %v503_v49  ;;  %v502_v50 = vsel %vm501_vm4, %v492_v48, %v494_v44  ;;  %v854_v44 = vsub.s32 2, %v845_v29 }
  0xd0   : > { %758 = vmatpush1.bf16.msra.mxu0 %v502_v50  ;;  %v858_v50 = vsub.s32 3, %v845_v29 }
  0xd1   : > { %v498_v51 = vpop.permute.xlu0 %497 }
  0xd2   : > { %v500_v52 = vpop.permute.xlu1 %499  ;;  %v504_v53 = vsel %vm501_vm4, %v496_v47, %v498_v51 }
  0xd3   : > { %v505_v54 = vsel %vm501_vm4, %v498_v51, %v500_v52 }
  0xd4   : > { %800 = vmatprep.subr.bf16.mxu1 %v505_v54 }
  0xd5   : > { %801 = vmatpush1.bf16.msra.mxu1 %v504_v53  ;;  %v537_v55 = vpop.permute.xlu0 %536 }
  0xd6   : > { %v539_v56 = vpop.permute.xlu1 %538 }
  0xd7   : > { %v546_v57 = vsel %vm544_vm5, %v537_v55, %v539_v56 }
  0xd8   : > { %759 = vmatprep.subr.bf16.mxu0 %v546_v57 }
  0xd9   : > { %v535_v58 = vpop.permute.xlu0 %534 }
  0xda   : > { %v541_v59 = vpop.permute.xlu1 %540  ;;  %v545_v60 = vsel %vm544_vm5, %v535_v58, %v537_v55 }
  0xdb   : > { %760 = vmatpush1.bf16.msra.mxu0 %v545_v60  ;;  %v547_v0 = vsel %vm544_vm5, %v539_v56, %v541_v59  ;;  %v2075_v56 = vrot.slane %v325_v32, %v854_v44 }
  0xdd   : > { %v543_v61 = vpop.permute.xlu0 %542 }
  0xde   : > { %v580_v62 = vpop.permute.xlu1 %579  ;;  %v548_v63 = vsel %vm544_vm5, %v541_v59, %v543_v61 }
  0xdf   : > { %802 = vmatprep.subr.bf16.mxu1 %v548_v63 }
  0xe0   : > { %803 = vmatpush1.bf16.msra.mxu1 %v547_v0 }
  0xe1   : > { %v582_v1 = vpop.permute.xlu0 %581 }
  0xe2   : > { %v578_v2 = vpop.permute.xlu1 %577  ;;  %v589_v3 = vsel %vm587_vm6, %v580_v62, %v582_v1 }
  0xe3   : > { %761 = vmatprep.subr.bf16.mxu0 %v589_v3  ;;  %v588_v4 = vsel %vm587_vm6, %v578_v2, %v580_v62 }
  0xe4   : > { %762 = vmatpush1.bf16.msra.mxu0 %v588_v4 }
  0xe5   : > { %v584_v5 = vpop.permute.xlu0 %583 }
  0xe6   : > { %v586_v6 = vpop.permute.xlu1 %585  ;;  %v590_v7 = vsel %vm587_vm6, %v582_v1, %v584_v5  ;;  %v2079_v1 = vrot.slane %v325_v32, %v858_v50 }
  0xe7   : > { %v591_v8 = vsel %vm587_vm6, %v584_v5, %v586_v6 }
  0xe8   : > { %804 = vmatprep.subr.bf16.mxu1 %v591_v8 }
  0xe9   : > { %805 = vmatpush1.bf16.msra.mxu1 %v590_v7  ;;  %v623_v9 = vpop.permute.xlu0 %622 }
  0xea   : > { %v625_v10 = vpop.permute.xlu1 %624 }
  0xeb   : > { %v632_v11 = vsel %vm630_vm7, %v623_v9, %v625_v10 }
  0xec   : > { %763 = vmatprep.subr.bf16.mxu0 %v632_v11 }
  0xed   : > { %v621_v12 = vpop.permute.xlu0 %620 }
  0xee   : > { %v627_v13 = vpop.permute.xlu1 %626  ;;  %v631_v14 = vsel %vm630_vm7, %v621_v12, %v623_v9 }
  0xef   : > { %764 = vmatpush1.bf16.msra.mxu0 %v631_v14  ;;  %v633_v18 = vsel %vm630_vm7, %v625_v10, %v627_v13 }
  0xf1   : > { %v629_v15 = vpop.permute.xlu0 %628 }
  0xf2   : > { %v666_v16 = vpop.permute.xlu1 %665  ;;  %v634_v17 = vsel %vm630_vm7, %v627_v13, %v629_v15 }
  0xf3   : > { %806 = vmatprep.subr.bf16.mxu1 %v634_v17 }
  0xf4   : > { %807 = vmatpush1.bf16.msra.mxu1 %v633_v18 }
  0xf5   : > { %v668_v19 = vpop.permute.xlu0 %667 }
  0xf6   : > { %v664_v20 = vpop.permute.xlu1 %663  ;;  %v675_v21 = vsel %vm673_vm8, %v666_v16, %v668_v19 }
  0xf7   : > { %765 = vmatprep.subr.bf16.mxu0 %v675_v21  ;;  %v674_v22 = vsel %vm673_vm8, %v664_v20, %v666_v16 }
  0xf8   : > { %766 = vmatpush1.bf16.msra.mxu0 %v674_v22  ;;  %v1685_v22 = vld [vmem:[%s2339_s3 + $0x4] ss:$8 sps:$4 sm:$0xff]  }
  0xf9   : > { %v670_v24 = vpop.permute.xlu0 %669 }
  0xfa   : > { %v672_v25 = vpop.permute.xlu1 %671  ;;  %v676_v26 = vsel %vm673_vm8, %v668_v19, %v670_v24 }
  0xfb   : > { %782 = vmatmul.mubr.bf16.vlgmr.msra.gmra.mrb[0].mxu0 %v1682_v23  ;;  %v677_v27 = vsel %vm673_vm8, %v670_v24, %v672_v25  ;;  %v1212_v24 = vld [vmem:[%s2340_s4 + $0x8] sm:$0xff] }
  0xfc   : > { %808 = vmatprep.subr.bf16.mxu1 %v677_v27  ;;  %1609 = vmatprep.mubr.msk.bf16.mxu0 %vm745_vm0, %v1685_v22 }
  0xfd   : > { %809 = vmatpush1.bf16.msra.mxu1 %v676_v26 }
 0x100   : > { %825 = vmatmul.mubr.bf16.vlgmr.msra.gmra.mrb[0].mxu1 %v1682_v23  ;;  %v1211_v23 = vld [vmem:[%s2340_s4] sm:$0xff] }
 0x101   : > { %1610 = vmatprep.mubr.msk.bf16.mxu1 %vm745_vm0, %v1685_v22 }
 0x10a   : > { %v729_v30 = vpop.permute.xlu0 %728 }
 0x10b   : > { %v734_v35 = vpop.permute.xlu1 %733 }
 0x1ce   : > { %v783_v33 = vpop.f32.mrb[0].mxu0 }
 0x1cf   : > { %v784_v36 = vadd.f32 %v783_v33, %v729_v30  ;;  %v785_v37 = vpop.f32.mrb[1].mxu0 }
 0x1d0   : > { %v786_v38 = vadd.f32 %v785_v37, %v729_v30  ;;  %v787_v39 = vpop.f32.mrb[2].mxu0 }
 0x1d1   : > { %v835_v40 = vmax.f32 %v784_v36, 0.0  ;;  %v788_v42 = vadd.f32 %v787_v39, %v734_v35  ;;  %v789_v43 = vpop.f32.mrb[3].mxu0 }
 0x1d2   : > { %v836_v45 = vmax.f32 %v786_v38, 0.0  ;;  %v790_v47 = vadd.f32 %v789_v43, %v734_v35 }
 0x1d3   : > { %v839_v48 = vmax.f32 %v788_v42, 0.0  ;;  %v826_v49 = vpop.f32.mrb[0].mxu1  ;;  %v864_v54 = vmul.f32 %v2069_v41, %v835_v40 }
 0x1d4   : > { %v840_v51 = vmax.f32 %v790_v47, 0.0  ;;  %v827_v52 = vadd.f32 %v826_v49, %v729_v30  ;;  %v828_v53 = vpop.f32.mrb[1].mxu1  ;;  %v865_v59 = vmul.f32 %v2071_v46, %v836_v45 }
 0x1d5   : > { %v868_v55 = vmul.f32 %v2069_v41, %v839_v48  ;;  %v829_v57 = vadd.f32 %v828_v53, %v729_v30  ;;  %v830_v58 = vpop.f32.mrb[2].mxu1 }
 0x1d6   : > { %v869_v60 = vmul.f32 %v2071_v46, %v840_v51  ;;  %v837_v61 = vmax.f32 %v827_v52, 0.0  ;;  %v831_v62 = vadd.f32 %v830_v58, %v734_v35  ;;  %v832_v63 = vpop.f32.mrb[3].mxu1 }
 0x1d7   : > { %v838_v0 = vmax.f32 %v829_v57, 0.0  ;;  %v833_v2 = vadd.f32 %v832_v63, %v734_v35  ;;  %v877_v3 = vpack.c.bf16 %v868_v55, %v864_v54 }
 0x1d8   : > { %v841_v4 = vmax.f32 %v831_v62, 0.0  ;;  %v878_v5 = vpack.c.bf16 %v869_v60, %v865_v59  ;;  %v866_v7 = vmul.f32 %v2075_v56, %v837_v61 }
 0x1d9   : > { %v842_v6 = vmax.f32 %v833_v2, 0.0  ;;  %885 = vrot.lane.b32.xlu1 %v877_v3, %s1802_s21  ;;  %v867_v9 = vmul.f32 %v2079_v1, %v838_v0 }
 0x1da   : > { %v870_v8 = vmul.f32 %v2075_v56, %v841_v4  ;;  %887 = vrot.lane.b32.xlu0 %v878_v5, %s1802_s21 }
 0x1db   : > { %v871_v10 = vmul.f32 %v2079_v1, %v842_v6 }
 0x1dc   : > { %v879_v11 = vpack.c.bf16 %v870_v8, %v866_v7 }
 0x1dd   : > { %v880_v12 = vpack.c.bf16 %v871_v10, %v867_v9 }
 0x1de   : > { %889 = vrot.lane.b32.xlu1 %v879_v11, %s1802_s21 }
 0x1df   : > { %891 = vrot.lane.b32.xlu0 %v880_v12, %s1802_s21 }
 0x24b   : > { %v886_v13 = vpop.permute.xlu1 %885 }
 0x24c   : > { %903 = vst.msk [vmem:[#allocation3] sm:$0xff] %vm902_vm9, %v886_v13  ;;  %v888_v14 = vpop.permute.xlu0 %887 }
 0x24d   : > { %v894_v15 = vsel %vm893_vm10, %v886_v13, %v888_v14 }
 0x24e   : > { %1235 = vmatprep.subr.bf16.mxu0 %v894_v15 }
 0x250   : > { %v890_v16 = vpop.permute.xlu1 %889 }
 0x251   : > { %v895_v17 = vsel %vm893_vm10, %v888_v14, %v890_v16  ;;  %v892_v18 = vpop.permute.xlu0 %891 }
 0x252   : > { %v896_v19 = vsel %vm893_vm10, %v890_v16, %v892_v18  ;;  %908 = vst.msk [vmem:[#allocation3 + $0x20] sm:$0xff] %vm893_vm10, %v892_v18 }
 0x253   : > { %v949_v20 = vld [vmem:[#allocation3] sm:$0xff]  ;;  %1278 = vmatprep.subr.bf16.mxu1 %v896_v19 }
 0x254   : > { %959 = vrot.lane.b32.xlu0 %v949_v20, %s1794_s23  ;;  %927 = vrot.lane.b32.xlu1 %v949_v20, %s1793_s15 }
 0x255   : > { %1236 = vmatpush1.bf16.msra.mxu0 %v949_v20  ;;  %1279 = vmatpush1.bf16.msra.mxu1 %v895_v17 }
 0x258   : > { %1023 = vrot.lane.b32.xlu0 %v949_v20, %s1796_s26  ;;  %991 = vrot.lane.b32.xlu1 %v949_v20, %s1795_s24 }
 0x259   : > { %v953_v21 = vld [vmem:[#allocation3 + $0x20] sm:$0xff] }
 0x25c   : > { %1087 = vrot.lane.b32.xlu0 %v949_v20, %s1798_s20  ;;  %1055 = vrot.lane.b32.xlu1 %v949_v20, %s1797_s10 }
 0x260   : > { %1151 = vrot.lane.b32.xlu0 %v949_v20, %s1800_s13  ;;  %1119 = vrot.lane.b32.xlu1 %v949_v20, %s1799_s25 }
 0x264   : > { %967 = vrot.lane.b32.xlu0 %v953_v21, %s1794_s23  ;;  %935 = vrot.lane.b32.xlu1 %v953_v21, %s1793_s15 }
 0x268   : > { %1031 = vrot.lane.b32.xlu0 %v953_v21, %s1796_s26  ;;  %999 = vrot.lane.b32.xlu1 %v953_v21, %s1795_s24 }
 0x26c   : > { %1095 = vrot.lane.b32.xlu0 %v953_v21, %s1798_s20  ;;  %1063 = vrot.lane.b32.xlu1 %v953_v21, %s1797_s10 }
 0x270   : > { %1127 = vrot.lane.b32.xlu1 %v953_v21, %s1799_s25  ;;  %931 = vrot.lane.b32.xlu0 %v895_v17, %s1793_s15 }
 0x274   : > { %929 = vrot.lane.b32.xlu1 %v894_v15, %s1793_s15  ;;  %933 = vrot.lane.b32.xlu0 %v896_v19, %s1793_s15  ;;  %s1803_s15 = smov [#allocation7]  }
 0x278   : > { %963 = vrot.lane.b32.xlu1 %v895_v17, %s1794_s23  ;;  %961 = vrot.lane.b32.xlu0 %v894_v15, %s1794_s23 }
 0x27c   : > { %965 = vrot.lane.b32.xlu1 %v896_v19, %s1794_s23  ;;  %995 = vrot.lane.b32.xlu0 %v895_v17, %s1795_s24  ;;  %s1726_s23 = sshll.u32 %s1803_s15, 4  ;;  %s1727_s23 = int_to_ptr.vmem [resolvable:$false] %s1726_s23 }
 0x280   : > { %993 = vrot.lane.b32.xlu1 %v894_v15, %s1795_s24  ;;  %997 = vrot.lane.b32.xlu0 %v896_v19, %s1795_s24  ;;  %s1728_s24 = scalar_lea.vmem %s1727_s23, 2048 }
 0x284   : > { %1027 = vrot.lane.b32.xlu1 %v895_v17, %s1796_s26  ;;  %1025 = vrot.lane.b32.xlu0 %v894_v15, %s1796_s26 }
 0x288   : > { %1029 = vrot.lane.b32.xlu1 %v896_v19, %s1796_s26  ;;  %1059 = vrot.lane.b32.xlu0 %v895_v17, %s1797_s10 }
 0x28c   : > { %1057 = vrot.lane.b32.xlu1 %v894_v15, %s1797_s10  ;;  %1061 = vrot.lane.b32.xlu0 %v896_v19, %s1797_s10 }
 0x290   : > { %1091 = vrot.lane.b32.xlu1 %v895_v17, %s1798_s20  ;;  %1089 = vrot.lane.b32.xlu0 %v894_v15, %s1798_s20 }
 0x294   : > { %1093 = vrot.lane.b32.xlu1 %v896_v19, %s1798_s20  ;;  %1123 = vrot.lane.b32.xlu0 %v895_v17, %s1799_s25 }
 0x298   : > { %1121 = vrot.lane.b32.xlu1 %v894_v15, %s1799_s25  ;;  %1125 = vrot.lane.b32.xlu0 %v896_v19, %s1799_s25  ;;  %s1616_s25 = sshll.u32 %s1872_s9, 10 }
 0x299   : > { %s2282_s14 = scalar_lea.hbm %s2344_s8, %s1616_s25 }
 0x29c   : > { %1155 = vrot.lane.b32.xlu1 %v895_v17, %s1800_s13  ;;  %1153 = vrot.lane.b32.xlu0 %v894_v15, %s1800_s13 }
 0x2a0   : > { %1157 = vrot.lane.b32.xlu1 %v896_v19, %s1800_s13  ;;  %1159 = vrot.lane.b32.xlu0 %v953_v21, %s1800_s13 }
 0x2a4   : > { %1215 = vperm.xlu1 %1681, %v1211_v23   ;;  %1220 = vperm.xlu0 %1680, %v1212_v24  }
 0x2c6   : > { %v960_v25 = vpop.permute.xlu0 %959  ;;  %v928_v26 = vpop.permute.xlu1 %927 }
 0x2ca   : > { %v1024_v27 = vpop.permute.xlu0 %1023  ;;  %v992_v28 = vpop.permute.xlu1 %991 }
 0x2ce   : > { %v2136_v29 = vpop.permute.xlu0 %1087  ;;  %v1056_v30 = vpop.permute.xlu1 %1055 }
 0x2d2   : > { %v2138_v31 = vpop.permute.xlu0 %1151  ;;  %v2140_v32 = vpop.permute.xlu1 %1119 }
 0x2d6   : > { %v968_v33 = vpop.permute.xlu0 %967  ;;  %v936_v34 = vpop.permute.xlu1 %935 }
 0x2da   : > { %v1032_v35 = vpop.permute.xlu0 %1031  ;;  %v1000_v36 = vpop.permute.xlu1 %999 }
 0x2de   : > { %v2142_v37 = vpop.permute.xlu0 %1095  ;;  %v1064_v38 = vpop.permute.xlu1 %1063 }
 0x2e2   : > { %v932_v39 = vpop.permute.xlu0 %931  ;;  %v2144_v40 = vpop.permute.xlu1 %1127 }
 0x2e6   : > { %v934_v42 = vpop.permute.xlu0 %933  ;;  %v930_v43 = vpop.permute.xlu1 %929 }
 0x2e7   : > { %v939_v44 = vsel %vm372_vm1, %v932_v39, %v934_v42  ;;  %v937_v45 = vsel %vm372_vm1, %v928_v26, %v930_v43  ;;  %v938_v47 = vsel %vm372_vm1, %v930_v43, %v932_v39  ;;  %v940_v48 = vsel %vm372_vm1, %v934_v42, %v936_v34 }
 0x2e8   : > { %1237 = vmatprep.subr.bf16.mxu0 %v938_v47  ;;  %1280 = vmatprep.subr.bf16.mxu1 %v940_v48 }
 0x2e9   : > { %1238 = vmatpush1.bf16.msra.mxu0 %v937_v45  ;;  %1281 = vmatpush1.bf16.msra.mxu1 %v939_v44 }
 0x2ea   : > { %v962_v49 = vpop.permute.xlu0 %961  ;;  %v964_v50 = vpop.permute.xlu1 %963 }
 0x2eb   : > { %v969_v51 = vsel %vm415_vm2, %v960_v25, %v962_v49  ;;  %v970_v52 = vsel %vm415_vm2, %v962_v49, %v964_v50 }
 0x2ec   : > { %1239 = vmatprep.subr.bf16.mxu0 %v970_v52 }
 0x2ed   : > { %1240 = vmatpush1.bf16.msra.mxu0 %v969_v51 }
 0x2ee   : > { %v996_v53 = vpop.permute.xlu0 %995  ;;  %v966_v54 = vpop.permute.xlu1 %965 }
 0x2ef   : > { %v971_v55 = vsel %vm415_vm2, %v964_v50, %v966_v54  ;;  %v972_v57 = vsel %vm415_vm2, %v966_v54, %v968_v33 }
 0x2f0   : > { %1282 = vmatprep.subr.bf16.mxu1 %v972_v57 }
 0x2f1   : > { %1283 = vmatpush1.bf16.msra.mxu1 %v971_v55 }
 0x2f2   : > { %v998_v58 = vpop.permute.xlu0 %997  ;;  %v994_v59 = vpop.permute.xlu1 %993 }
 0x2f3   : > { %v1003_v60 = vsel %vm458_vm3, %v996_v53, %v998_v58  ;;  %v1001_v61 = vsel %vm458_vm3, %v992_v28, %v994_v59  ;;  %v1002_v62 = vsel %vm458_vm3, %v994_v59, %v996_v53  ;;  %v1004_v63 = vsel %vm458_vm3, %v998_v58, %v1000_v36 }
 0x2f4   : > { %1241 = vmatprep.subr.bf16.mxu0 %v1002_v62  ;;  %1284 = vmatprep.subr.bf16.mxu1 %v1004_v63 }
 0x2f5   : > { %1242 = vmatpush1.bf16.msra.mxu0 %v1001_v61  ;;  %1285 = vmatpush1.bf16.msra.mxu1 %v1003_v60 }
 0x2f6   : > { %v1026_v0 = vpop.permute.xlu0 %1025  ;;  %v1028_v2 = vpop.permute.xlu1 %1027 }
 0x2f7   : > { %v1033_v3 = vsel %vm501_vm4, %v1024_v27, %v1026_v0  ;;  %v1034_v4 = vsel %vm501_vm4, %v1026_v0, %v1028_v2 }
 0x2f8   : > { %1243 = vmatprep.subr.bf16.mxu0 %v1034_v4 }
 0x2f9   : > { %1244 = vmatpush1.bf16.msra.mxu0 %v1033_v3 }
 0x2fa   : > { %v1060_v5 = vpop.permute.xlu0 %1059  ;;  %v1030_v6 = vpop.permute.xlu1 %1029 }
 0x2fb   : > { %v1035_v7 = vsel %vm501_vm4, %v1028_v2, %v1030_v6  ;;  %v1036_v8 = vsel %vm501_vm4, %v1030_v6, %v1032_v35 }
 0x2fc   : > { %1286 = vmatprep.subr.bf16.mxu1 %v1036_v8 }
 0x2fd   : > { %1287 = vmatpush1.bf16.msra.mxu1 %v1035_v7 }
 0x2fe   : > { %v1062_v9 = vpop.permute.xlu0 %1061  ;;  %v1058_v10 = vpop.permute.xlu1 %1057 }
 0x2ff   : > { %v1067_v11 = vsel %vm544_vm5, %v1060_v5, %v1062_v9  ;;  %v1065_v12 = vsel %vm544_vm5, %v1056_v30, %v1058_v10  ;;  %v1066_v13 = vsel %vm544_vm5, %v1058_v10, %v1060_v5  ;;  %v1068_v14 = vsel %vm544_vm5, %v1062_v9, %v1064_v38  ;;  %v1390_v10 = vld [vmem:[%s2341_s5 + $0x8] sm:$0xff] }
 0x300   : > { %1245 = vmatprep.subr.bf16.mxu0 %v1066_v13  ;;  %1288 = vmatprep.subr.bf16.mxu1 %v1068_v14  ;;  %v1429_v13 = vld [vmem:[%s1953_s18] sm:$0xff] }
 0x301   : > { %1246 = vmatpush1.bf16.msra.mxu0 %v1065_v12  ;;  %1289 = vmatpush1.bf16.msra.mxu1 %v1067_v11  ;;  %v1409_v11 = vld [vmem:[%s2342_s6] sm:$0xff]  ;;  %v1410_v14 = vld [vmem:[%s2342_s6 + $0x8] sm:$0xff] }
 0x302   : > { %v1090_v15 = vpop.permute.xlu0 %1089  ;;  %v1092_v16 = vpop.permute.xlu1 %1091  ;;  %v1389_v12 = vld [vmem:[%s2341_s5] sm:$0xff] }
 0x303   : > { %v1097_v17 = vsel %vm587_vm6, %v2136_v29, %v1090_v15  ;;  %v1098_v18 = vsel %vm587_vm6, %v1090_v15, %v1092_v16  ;;  %v1431_v15 = vld [vmem:[%s1953_s18 + $0x10] sm:$0xff] }
 0x304   : > { %1247 = vmatprep.subr.bf16.mxu0 %v1098_v18  ;;  %v1432_v18 = vld [vmem:[%s1953_s18 + $0x18] sm:$0xff] }
 0x305   : > { %1248 = vmatpush1.bf16.msra.mxu0 %v1097_v17  ;;  %v1433_v17 = vld [vmem:[%s1953_s18 + $0x20] sm:$0xff] }
 0x306   : > { %v1124_v19 = vpop.permute.xlu0 %1123  ;;  %v1094_v20 = vpop.permute.xlu1 %1093 }
 0x307   : > { %v1099_v21 = vsel %vm587_vm6, %v1092_v16, %v1094_v20  ;;  %v1100_v22 = vsel %vm587_vm6, %v1094_v20, %v2142_v37  ;;  %v1430_v16 = vld [vmem:[%s1953_s18 + $0x8] sm:$0xff] }
 0x308   : > { %1290 = vmatprep.subr.bf16.mxu1 %v1100_v22  ;;  %v1434_v20 = vld [vmem:[%s1953_s18 + $0x28] sm:$0xff] }
 0x309   : > { %1291 = vmatpush1.bf16.msra.mxu1 %v1099_v21 }
 0x30a   : > { %v1126_v23 = vpop.permute.xlu0 %1125  ;;  %v1122_v24 = vpop.permute.xlu1 %1121 }
 0x30b   : > { %v1131_v25 = vsel %vm630_vm7, %v1124_v19, %v1126_v23  ;;  %v1129_v26 = vsel %vm630_vm7, %v2140_v32, %v1122_v24  ;;  %v1130_v27 = vsel %vm630_vm7, %v1122_v24, %v1124_v19  ;;  %v1132_v28 = vsel %vm630_vm7, %v1126_v23, %v2144_v40  ;;  %v1687_v32 = vld [vmem:[%s2339_s3] ss:$8 sps:$4 sm:$0xff]  }
 0x30c   : > { %1249 = vmatprep.subr.bf16.mxu0 %v1130_v27  ;;  %1292 = vmatprep.subr.bf16.mxu1 %v1132_v28  ;;  %v1435_v19 = vld [vmem:[%s1953_s18 + $0x30] sm:$0xff] }
 0x30d   : > { %1250 = vmatpush1.bf16.msra.mxu0 %v1129_v26  ;;  %1293 = vmatpush1.bf16.msra.mxu1 %v1131_v25 }
 0x30e   : > { %v1154_v29 = vpop.permute.xlu0 %1153  ;;  %v1156_v30 = vpop.permute.xlu1 %1155 }
 0x30f   : > { %v1161_v33 = vsel %vm673_vm8, %v2138_v31, %v1154_v29  ;;  %v1162_v34 = vsel %vm673_vm8, %v1154_v29, %v1156_v30 }
 0x310   : > { %1251 = vmatprep.subr.bf16.mxu0 %v1162_v34 }
 0x311   : > { %1252 = vmatpush1.bf16.msra.mxu0 %v1161_v33 }
 0x312   : > { %v1160_v35 = vpop.permute.xlu0 %1159  ;;  %v1158_v36 = vpop.permute.xlu1 %1157 }
 0x313   : > { %v1163_v37 = vsel %vm673_vm8, %v1156_v30, %v1158_v36  ;;  %v1164_v38 = vsel %vm673_vm8, %v1158_v36, %v1160_v35 }
 0x314   : > { %1268 = vmatmul.mubr.bf16.vlgmr.msra.gmra.mrb[4].mxu0 %v1687_v32  ;;  %1294 = vmatprep.subr.bf16.mxu1 %v1164_v38 }
 0x315   : > { %1295 = vmatpush1.bf16.msra.mxu1 %v1163_v37 }
 0x318   : > { %1311 = vmatmul.mubr.bf16.vlgmr.msra.gmra.mrb[4].mxu1 %v1687_v32 }
 0x323   : > { %v1216_v39 = vpop.permute.xlu1 %1215  ;;  %v1221_v43 = vpop.permute.xlu0 %1220 }
 0x3e7   : > { %v1269_v31 = vpop.f32.mrb[4].mxu0 }
 0x3e8   : > { %v1270_v40 = vadd.f32 %v1269_v31, %v1216_v39  ;;  %v1271_v42 = vpop.f32.mrb[5].mxu0 }
 0x3e9   : > { %v1272_v44 = vadd.f32 %v1271_v42, %v1216_v39  ;;  %v1273_v45 = vpop.f32.mrb[6].mxu0 }
 0x3ea   : > { %v1321_v47 = vmul.f32 %v1270_v40, %v2069_v41  ;;  %v1274_v48 = vadd.f32 %v1273_v45, %v1221_v43  ;;  %v1275_v49 = vpop.f32.mrb[7].mxu0 }
 0x3eb   : > { %v1322_v50 = vmul.f32 %v1272_v44, %v2071_v46  ;;  %v1276_v51 = vadd.f32 %v1275_v49, %v1221_v43  ;;  %v1312_v52 = vpop.f32.mrb[4].mxu1 }
 0x3ec   : > { %v1325_v53 = vmul.f32 %v1274_v48, %v2069_v41  ;;  %v1313_v54 = vadd.f32 %v1312_v52, %v1216_v39  ;;  %v1314_v55 = vpop.f32.mrb[5].mxu1 }
 0x3ed   : > { %v1329_v57 = vadd.f32 %v1322_v50, %v1321_v47  ;;  %v1326_v58 = vmul.f32 %v1276_v51, %v2071_v46  ;;  %v1315_v59 = vadd.f32 %v1314_v55, %v1216_v39  ;;  %v1316_v60 = vpop.f32.mrb[6].mxu1  ;;  %v1438_v55 = vld [vmem:[%s1953_s18 + $0x48] sm:$0xff] }
 0x3ee   : > { %v1323_v61 = vmul.f32 %v1313_v54, %v2075_v56  ;;  %v1317_v62 = vadd.f32 %v1316_v60, %v1221_v43  ;;  %v1318_v63 = vpop.f32.mrb[7].mxu1 }
 0x3ef   : > { %v1334_v0 = vadd.f32 %v1326_v58, %v1325_v53  ;;  %v1324_v2 = vmul.f32 %v1315_v59, %v2079_v1  ;;  %v1319_v3 = vadd.f32 %v1318_v63, %v1221_v43 }
 0x3f0   : > { %v1327_v4 = vmul.f32 %v1317_v62, %v2075_v56  ;;  %v1330_v5 = vadd.f32 %v1329_v57, %v1323_v61 }
 0x3f1   : > { %v1328_v6 = vmul.f32 %v1319_v3, %v2079_v1 }
 0x3f2   : > { %v1331_v7 = vadd.f32 %v1330_v5, %v1324_v2  ;;  %v1335_v8 = vadd.f32 %v1334_v0, %v1327_v4 }
 0x3f4   : > { %1332 = vadd.xlane.f32.xlu1 %v1331_v7  ;;  %v1336_v9 = vadd.f32 %v1335_v8, %v1328_v6 }
 0x3f6   : > { %1337 = vadd.xlane.f32.xlu0 %v1336_v9 }
 0x405   : > { %1398 = vperm.xlu1 %1681, %v1390_v10  }
 0x409   : > { %1413 = vperm.xlu1 %1681, %v1409_v11  }
 0x40c   : > { %1393 = vperm.xlu0 %1680, %v1389_v12  }
 0x40d   : > { %1449 = vrot.lane.b32.xlu1 %v1429_v13, %s1796_s26 }
 0x410   : > { %1418 = vperm.xlu0 %1680, %v1410_v14  }
 0x411   : > { %1453 = vrot.lane.b32.xlu1 %v1431_v15, %s1796_s26 }
 0x414   : > { %1451 = vrot.lane.b32.xlu0 %v1430_v16, %s1796_s26 }
 0x415   : > { %1457 = vrot.lane.b32.xlu1 %v1433_v17, %s1796_s26 }
 0x418   : > { %1455 = vrot.lane.b32.xlu0 %v1432_v18, %s1796_s26 }
 0x419   : > { %1461 = vrot.lane.b32.xlu1 %v1435_v19, %s1796_s26 }
 0x41c   : > { %1459 = vrot.lane.b32.xlu0 %v1434_v20, %s1796_s26 }
 0x481   : > { %v1333_v21 = vpop.xlane.xlu1 %1332 }
 0x482   : > { %v1339_v22 = vmul.f32 0.0020833334, %v1333_v21 }
 0x483   : > { %v1338_v23 = vpop.xlane.xlu0 %1337 }
 0x484   : > { %v2220_v24 = vsub.f32 %v1270_v40, %v1339_v22  ;;  %v2222_v25 = vsub.f32 %v1272_v44, %v1339_v22  ;;  %v2224_v26 = vsub.f32 %v1313_v54, %v1339_v22  ;;  %v1340_v27 = vmul.f32 0.0020833334, %v1338_v23  ;;  %v1437_v54 = vld [vmem:[%s1953_s18 + $0x40] sm:$0xff] }
 0x485   : > { %v2226_v28 = vsub.f32 %v1315_v59, %v1339_v22  ;;  %v1399_v57 = vpop.permute.xlu1 %1398 }
 0x486   : > { %v2228_v29 = vsub.f32 %v1274_v48, %v1340_v27  ;;  %v2230_v30 = vsub.f32 %v1276_v51, %v1340_v27  ;;  %v2232_v33 = vsub.f32 %v1317_v62, %v1340_v27  ;;  %v1349_v34 = vmul.f32 %v2220_v24, %v2069_v41 }
 0x487   : > { %v1350_v32 = vmul.f32 %v2222_v25, %v2071_v46  ;;  %v1351_v35 = vmul.f32 %v2224_v26, %v2075_v56  ;;  %v2240_v36 = vsub.f32 %v1319_v3, %v1340_v27  ;;  %v1352_v40 = vmul.f32 %v2226_v28, %v2079_v1 }
 0x488   : > { %v1357_v37 = vmul.f32 %v1349_v34, %v1349_v34  ;;  %v1353_v38 = vmul.f32 %v2228_v29, %v2069_v41  ;;  %v1354_v39 = vmul.f32 %v2230_v30, %v2071_v46  ;;  %v1355_v31 = vmul.f32 %v2232_v33, %v2075_v56 }
 0x489   : > { %v1358_v42 = vmul.f32 %v1350_v32, %v1350_v32  ;;  %v1356_v43 = vmul.f32 %v2240_v36, %v2079_v1  ;;  %v1359_v47 = vmul.f32 %v1351_v35, %v1351_v35  ;;  %v1360_v46 = vmul.f32 %v1352_v40, %v1352_v40  ;;  %v1436_v1 = vld [vmem:[%s1953_s18 + $0x38] sm:$0xff]  ;;  %v1414_v58 = vpop.permute.xlu1 %1413  ;;  %s1602_s18 = sshll.u32 %s1949_s19, 6 }
 0x48a   : > { %v1361_v44 = vmul.f32 %v1353_v38, %v1353_v38  ;;  %v1362_v45 = vmul.f32 %v1354_v39, %v1354_v39  ;;  %v1363_v48 = vmul.f32 %v1355_v31, %v1355_v31 }
 0x48b   : > { %v1365_v41 = vadd.f32 %v1358_v42, %v1357_v37  ;;  %v1364_v51 = vmul.f32 %v1356_v43, %v1356_v43  ;;  %v1394_v59 = vpop.permute.xlu0 %1393 }
 0x48c   : > { %v1370_v49 = vadd.f32 %v1362_v45, %v1361_v44 }
 0x48d   : > { %v1366_v50 = vadd.f32 %v1365_v41, %v1359_v47  ;;  %v1450_v60 = vpop.permute.xlu1 %1449 }
 0x48e   : > { %v1371_v56 = vadd.f32 %v1370_v49, %v1363_v48 }
 0x48f   : > { %v1367_v52 = vadd.f32 %v1366_v50, %v1360_v46  ;;  %v1419_v61 = vpop.permute.xlu0 %1418 }
 0x490   : > { %v1372_v53 = vadd.f32 %v1371_v56, %v1364_v51 }
 0x491   : > { %1368 = vadd.xlane.f32.xlu0 %v1367_v52  ;;  %v1454_v62 = vpop.permute.xlu1 %1453 }
 0x492   : > { %1373 = vadd.xlane.f32.xlu1 %v1372_v53 }
 0x493   : > { %v1452_v63 = vpop.permute.xlu0 %1451 }
 0x494   : > { %v1470_v14 = vsel %vm501_vm4, %v1450_v60, %v1452_v63  ;;  %v1471_v15 = vsel %vm501_vm4, %v1452_v63, %v1454_v62 }
 0x495   : > { %v1458_v0 = vpop.permute.xlu1 %1457 }
 0x497   : > { %v1456_v2 = vpop.permute.xlu0 %1455 }
 0x498   : > { %v1472_v16 = vsel %vm501_vm4, %v1454_v62, %v1456_v2  ;;  %v1473_v17 = vsel %vm501_vm4, %v1456_v2, %v1458_v0 }
 0x499   : > { %v1462_v4 = vpop.permute.xlu1 %1461 }
 0x49b   : > { %v1460_v3 = vpop.permute.xlu0 %1459 }
 0x49c   : > { %v1474_v19 = vsel %vm501_vm4, %v1460_v3, %v1462_v4 }
 0x4a3   : > { %1465 = vrot.lane.b32.xlu1 %v1437_v54, %s1796_s26 }
 0x4a7   : > { %1463 = vrot.lane.b32.xlu0 %v1436_v1, %s1796_s26 }
 0x4ab   : > { %1467 = vrot.lane.b32.xlu0 %v1438_v55, %s1796_s26  ;;  %s2275_s26 = scalar_lea.vmem [#allocation7], %s1602_s18 }
 0x4ac   : > { %s1524_s22 = sshll.u32 %s2275_s26, 4  ;;  %s2284_s22 = int_to_ptr.vmem [resolvable:$true] %s1524_s22 }
 0x4ad   : > { %s1722_s21 = scalar_lea.vmem %s2284_s22, 1024  ;;  %p1729_p8 = scmp.lt.s32.totalorder %s2284_s22, %s1727_s23 }
 0x4ae   : > { %p1723_p6 = scmp.ne.s32.totalorder %s2284_s22, %s1722_s21  ;;  %p1730_p10 = scmp.lt.s32.totalorder %s1728_s24, %s1722_s21 }
 0x4b0   : > { %p1724_p12 = pnand %p1723_p6, %p2351_p11  ;;  %p1731_p0 = por %p1730_p10, %p1729_p8 }
 0x4b2   : > { %p1725_p13 = pneg %p1724_p12 }
 0x4b4   : > { %p1732_p2 = pnand %p1731_p0, %p1725_p13 }
 0x51e   : > { %v1369_v5 = vpop.xlane.xlu0 %1368 }
 0x51f   : > { %v1375_v6 = vmul.f32 0.0020833334, %v1369_v5  ;;  %v1374_v7 = vpop.xlane.xlu1 %1373 }
 0x520   : > { %v1376_v8 = vmul.f32 0.0020833334, %v1374_v7 }
 0x521   : > { %v1377_v9 = vadd.f32 1e-05, %v1375_v6 }
 0x522   : > { %v1378_v10 = vadd.f32 1e-05, %v1376_v8  ;;  %v1464_v11 = vpop.permute.xlu0 %1463 }
 0x523   : > { %1688 = vrsqrt.f32 %v1377_v9  ;;  %v1466_v12 = vpop.permute.xlu1 %1465  ;;  %v1475_v20 = vsel %vm501_vm4, %v1462_v4, %v1464_v11 }
 0x524   : > { %1690 = vrsqrt.f32 %v1378_v10  ;;  %v1476_v21 = vsel %vm501_vm4, %v1464_v11, %v1466_v12 }
 0x526   : > { %v1468_v13 = vpop.permute.xlu0 %1467 }
 0x527   : > { %v1477_v22 = vsel %vm501_vm4, %v1466_v12, %v1468_v13 }
 0x52d   : > { %v1689_v18 = vpop.eup %1688 }
 0x52e   : > { %v1691_v23 = vpop.eup %1690  ;;  %v1381_v27 = vmul.f32 %v1689_v18, %v2220_v24  ;;  %v1382_v34 = vmul.f32 %v1689_v18, %v2222_v25  ;;  %v1383_v32 = vmul.f32 %v1689_v18, %v2224_v26  ;;  %v1384_v35 = vmul.f32 %v1689_v18, %v2226_v28 }
 0x52f   : > { %v1385_v37 = vmul.f32 %v1691_v23, %v2228_v29  ;;  %v1386_v38 = vmul.f32 %v1691_v23, %v2230_v30  ;;  %v1387_v39 = vmul.f32 %v1691_v23, %v2232_v33  ;;  %v1388_v31 = vmul.f32 %v1691_v23, %v2240_v36 }
 0x530   : > { %v1401_v40 = vmul.f32 %v1394_v59, %v1381_v27  ;;  %v1402_v42 = vmul.f32 %v1394_v59, %v1382_v34  ;;  %v1403_v43 = vmul.f32 %v1394_v59, %v1383_v32  ;;  %v1404_v44 = vmul.f32 %v1394_v59, %v1384_v35 }
 0x531   : > { %v1405_v24 = vmul.f32 %v1399_v57, %v1385_v37  ;;  %v1406_v45 = vmul.f32 %v1399_v57, %v1386_v38  ;;  %v1407_v25 = vmul.f32 %v1399_v57, %v1387_v39  ;;  %v1408_v47 = vmul.f32 %v1399_v57, %v1388_v31 }
 0x532   : > { %v1421_v26 = vadd.f32 %v1414_v58, %v1401_v40  ;;  %v1422_v41 = vadd.f32 %v1414_v58, %v1402_v42  ;;  %v1423_v28 = vadd.f32 %v1414_v58, %v1403_v43  ;;  %v1424_v48 = vadd.f32 %v1414_v58, %v1404_v44 }
 0x533   : > { %v1425_v29 = vadd.f32 %v1419_v61, %v1405_v24  ;;  %v1426_v30 = vadd.f32 %v1419_v61, %v1406_v45  ;;  %v1427_v33 = vadd.f32 %v1419_v61, %v1407_v25  ;;  %v1428_v36 = vadd.f32 %v1419_v61, %v1408_v47 }
 0x534   : > { %v1486_v49 = vadd.f32 %v1470_v14, %v1421_v26  ;;  %v1487_v46 = vadd.f32 %v1471_v15, %v1422_v41  ;;  %v1488_v50 = vadd.f32 %v1472_v16, %v1423_v28  ;;  %v1489_v51 = vadd.f32 %v1473_v17, %v1424_v48 }
 0x535   : > { %v1490_v56 = vadd.f32 %v1474_v19, %v1425_v29  ;;  %v1491_v52 = vadd.f32 %v1475_v20, %v1426_v30  ;;  %v1492_v53 = vadd.f32 %v1476_v21, %v1427_v33  ;;  %v1493_v54 = vadd.f32 %v1477_v22, %v1428_v36 }
 0x536   : > { %v1494_v1 = vmax.f32 %v1486_v49, 0.0  ;;  %v1495_v55 = vmax.f32 %v1487_v46, 0.0  ;;  %v1496_v57 = vmax.f32 %v1488_v50, 0.0  ;;  %v1497_v58 = vmax.f32 %v1489_v51, 0.0 }
 0x537   : > { %v1498_v59 = vmax.f32 %v1490_v56, 0.0  ;;  %v1499_v60 = vmax.f32 %v1491_v52, 0.0  ;;  %v1500_v61 = vmax.f32 %v1492_v53, 0.0  ;;  %v1501_v62 = vmax.f32 %v1493_v54, 0.0 }
 0x538   : > { %1502 = vst [vmem:[%s2275_s26] sm:$0xff] %v1494_v1  ;;  %1503 = vst [vmem:[%s2275_s26 + $0x8] sm:$0xff] %v1495_v55 }
 0x539   : > { %1504 = vst [vmem:[%s2275_s26 + $0x10] sm:$0xff] %v1496_v57  ;;  %1505 = vst [vmem:[%s2275_s26 + $0x18] sm:$0xff] %v1497_v58 }
 0x53a   : > { %1506 = vst [vmem:[%s2275_s26 + $0x20] sm:$0xff] %v1498_v59  ;;  %1507 = vst [vmem:[%s2275_s26 + $0x28] sm:$0xff] %v1499_v60 }
 0x53b   : > { %1508 = vst [vmem:[%s2275_s26 + $0x30] sm:$0xff] %v1500_v61  ;;  %1509 = vst [vmem:[%s2275_s26 + $0x38] sm:$0xff] %v1501_v62 }
 0x53c   : > { %1735 = shalt.err (!%p1732_p2)
}
 0x53d   : > { %s1736_s10 = scalar_lea.hbm %s2282_s14, 1024  ;;  %s1740_s26 = scalar_lea.hbm %s2344_s8, 2048 }
 0x53e   : > { %p1737_p4 = scmp.ne.s32.totalorder %s2282_s14, %s1736_s10  ;;  %p1741_p9 = scmp.lt.u32.totalorder %s2282_s14, %s2344_s8 }
 0x53f   : > { %p1742_p1 = scmp.lt.u32.totalorder %s1740_s26, %s1736_s10  ;;  %p1744_p6 = scmp.lt.u32.totalorder %s1736_s10, %s2282_s14 }
 0x540   : > { %p1738_p5 = pnand %p1737_p4, %p2351_p11 }
 0x541   : > { %p1743_p3 = por %p1742_p1, %p1741_p9 }
 0x542   : > { %p1739_p7 = pneg %p1738_p5 }
 0x543   : > { %p1745_p12 = por %p1744_p6, %p1743_p3 }
 0x545   : > { %p1746_p13 = pnand %p1745_p12, %p1739_p7 }
 0x547   : > { %1749 = shalt.err (!%p1746_p13)
}
 0x548   : > { %s1804_s13 = smov 512   ;;  %s1805_s21 = smov 32  }
 0x549   : > { %1622 = dma.vmem_to_hbm [thread:$0]  (%p2351_p11), %s2284_s22, 1024, %s2282_s14, %s1511_s12, %s1804_s13, %s1804_s13, %s1805_s21  }
 0x54a PF: > { %s1539_s15 = sand.u32 1, %s1776_s27   ;;  %p2352_p8 = scmp.ne.s32.totalorder %s2349_s17, 0 }
 0x54b   : > { %p2353_p10 = scmp.ge.s32.totalorder %s1788_s30, 2  ;;  %s1540_s23 = scalar_lea.sflag [#allocation6], %s1539_s15 }
 0x54d   : > { %p1629_p0 = pnand %p2353_p10, %p2352_p8 }
 0x54f   : > { %1771 = dma.done.wait (!%p1629_p0), %s1540_s23, 1024  }
 0x550   : > { %1773 = vsyncadd (!%p1629_p0), %s1540_s23, 4294966272  ;;  %s2354_s24 = sld [smem:[#allocation10_spill]]  ;;  %p21_p2 = scmp.ge.s32.totalorder %s1876_s11, 4  }
 0x551   : > { %s2355_s27 = smov %s1780_s28  ;;  %s2356_s28 = smov %s1784_s29 }
 0x552   : > { %s2358_s30 = smov %s1876_s11  ;;  %23 = sbr.rel (!%p21_p2) target bundleno = 5 (0x5), region = 97 }
 0x556   : > { %s2357_s29 = smov %s2354_s24 }
 0x559   :  { %1545 = vsyncpa [#allocation5], 1 }
 0x55a   :  { %1547 = vsyncpa [#allocation5 + $0x1], 1 }
 0x55b   :  { %1548 = vsyncpa [#allocation6], 1 }
 0x55c   :  { %1550 = vsyncpa [#allocation6 + $0x1], 1 }

</bundles_post_ra>
